<compile_context>
chip_gen: v7x
topology: tpu7x:2x2x1
jax: 0.10.0
libtpu: 0.0.40
codegen_flags: <defaults>
</compile_context>

<pallas_src>
import functools

import jax
import jax.numpy as jnp
from jax import lax
from jax.experimental import pallas as pl
from jax.experimental.pallas import tpu as pltpu


# ----------------------------------------------------------------------------
# Kernel helpers
# ----------------------------------------------------------------------------

def _pack8(c0, c1, c2, c3, c4):
    """Lane-pack five (K,1) columns into a (K,8) tile (cols 5..7 zero)."""
    k = c0.shape[0]
    col = lax.broadcasted_iota(jnp.int32, (k, 8), 1)
    zero = jnp.zeros((k, 8), jnp.float32)
    out = jnp.where(col == 0, c0, zero)
    out = out + jnp.where(col == 1, c1, zero)
    out = out + jnp.where(col == 2, c2, zero)
    out = out + jnp.where(col == 3, c3, zero)
    out = out + jnp.where(col == 4, c4, zero)
    return out


# ----------------------------------------------------------------------------
# Fused kernel (grid = (batch blocks, full-res M tiles))
# ----------------------------------------------------------------------------

def fused_forward_kernel(
    x_ref,        # (Bt, 3, 2N)   lane-packed [cj | warped] downsampled inputs
    g_ref,        # (8, N)        moment basis [1, gx, gy, gx^2, gx*gy, gy^2, 0, 0]
    grid2_ref,    # (2, mt)       full-res coord tile [gx2; gy2]
    se_ref,       # (K+F, 4)      shape-encoder weight | bias
    app_ref,      # (C, K+F+1)    appearance-encoder weight | bias
    dec_ref,      # (3, K+C+1)    decoder weight | bias
    recon_ref,    # (Bt, 3, mt)   reconstruction tile
    hm_ref,       # (Bt, 2K, N)   [cj heatmaps ; warped heatmaps]
    gm_ref,       # (Bt, K, mt)   cj gaussian maps tile
    par_ref,      # (Bt, 2K, 8)   packed gauss params [cj ; warped]
    par_scr,      # VMEM (Bt, K, 8): [mu_x, mu_y, ixx, ixy, iyy, 0,0,0]
    av_scr,       # VMEM (Bt, K, C): pooled appearance vectors
    *, K, F, C, N, use_identity_covariance, fixed_covar):

    m = pl.program_id(1)
    Bt = x_ref.shape[0]

    # ------------- encode phase: only on the first M-tile --------------------
    @pl.when(m == 0)
    def _encode():
        G = g_ref[...]                        # (8, N)
        w_se = se_ref[:, 0:3]                 # (K+F, 3)
        b_se = se_ref[:, 3:4]                 # (K+F, 1)
        w_app_k = app_ref[:, 0:K]             # (C, K)
        w_app_f = app_ref[:, K:K + F]         # (C, F)
        b_app = app_ref[:, K + F:K + F + 1]   # (C, 1)

        def moments(enc):
            # spatial softmax + all moments via ONE MXU matmul against G
            mmax = jnp.max(enc, axis=-1, keepdims=True)
            p = jnp.exp(enc - mmax)                                    # (K, N)
            raw = lax.dot_general(p, G, (((1,), (1,)), ((), ())),
                                  preferred_element_type=jnp.float32)  # (K, 8)
            inv_mass = pl.reciprocal(raw[:, 0:1], approx=True)
            h = p * inv_mass                      # normalized heatmap (sums~1)
            mu_x = raw[:, 1:2] * inv_mass
            mu_y = raw[:, 2:3] * inv_mass
            if use_identity_covariance:
                cxx = jnp.full_like(mu_x, fixed_covar)
                cyy = jnp.full_like(mu_x, fixed_covar)
                cxy = jnp.zeros_like(mu_x)
            else:
                # E[x^2] - mu^2 (clamped) == E[(x-mu)^2] up to approx-recip err
                cxx = jnp.maximum(raw[:, 3:4] * inv_mass - mu_x * mu_x, 0.0) + 1e-4
                cxy = raw[:, 4:5] * inv_mass - mu_x * mu_y
                cyy = jnp.maximum(raw[:, 5:6] * inv_mass - mu_y * mu_y, 0.0) + 1e-4
            return h, mu_x, mu_y, cxx, cxy, cyy

        for bi in range(Bt):
            x = x_ref[bi]                                              # (3, 2N)
            # ONE shape-encoder matmul over both inputs (lane-packed)
            enc_all = jnp.dot(w_se, x, preferred_element_type=jnp.float32) + b_se
            cj_enc = enc_all[0:K, 0:N]
            w_enc = enc_all[0:K, N:2 * N]
            w_feats = enc_all[K:K + F, N:2 * N]

            cj_h, cj_mux, cj_muy, cj_cxx, cj_cxy, cj_cyy = moments(cj_enc)
            w_h, w_mux, w_muy, w_cxx, w_cxy, w_cyy = moments(w_enc)

            # appearance encode (split matmul == cat([part, feats]) then 1x1)
            app = (jnp.dot(w_app_k, w_h, preferred_element_type=jnp.float32)
                   + jnp.dot(w_app_f, w_feats, preferred_element_type=jnp.float32)
                   + b_app)                                            # (C, N)
            # pool: mean over space of featmap * heatmap  -> (K, C)
            av = lax.dot_general(w_h, app, (((1,), (1,)), ((), ())),
                                 preferred_element_type=jnp.float32) * (1.0 / N)
            av_scr[bi] = av

            # inverse covariance of the cj gaussians (for the render phase)
            det = cj_cxx * cj_cyy - cj_cxy * cj_cxy + 1e-6
            inv_det = pl.reciprocal(det, approx=True)
            par_scr[bi] = _pack8(cj_mux, cj_muy,
                                 cj_cyy * inv_det, -cj_cxy * inv_det,
                                 cj_cxx * inv_det)

            # merged small outputs (heatmaps, packed gaussian params)
            hm_ref[bi, 0:K, :] = cj_h
            hm_ref[bi, K:2 * K, :] = w_h
            par_ref[bi, 0:K, :] = _pack8(cj_mux, cj_muy, cj_cxx, cj_cxy, cj_cyy)
            par_ref[bi, K:2 * K, :] = _pack8(w_mux, w_muy, w_cxx, w_cxy, w_cyy)

    # ------------- render / project / decode phase (every M-tile) ------------
    g2 = grid2_ref[...]
    gx2 = g2[0:1, :]                                                   # (1, mt)
    gy2 = g2[1:2, :]
    w_dec_k = dec_ref[:, 0:K]                                          # (3, K)
    w_dec_c = dec_ref[:, K:K + C]                                      # (3, C)
    b_dec = dec_ref[:, K + C:K + C + 1]                                # (3, 1)

    for bi in range(Bt):
        pr = par_scr[bi]                                               # (K, 8)
        mu_x = pr[:, 0:1]
        mu_y = pr[:, 1:2]
        ixx = pr[:, 2:3]
        ixy = pr[:, 3:4]
        iyy = pr[:, 4:5]

        # TODO(synk): exact gaussian_params_to_heatmap formula from the original
        #             repo is unavailable; standard unnormalized Gaussian assumed.
        dx = gx2 - mu_x                                                # (K, mt)
        dy = gy2 - mu_y
        quad = ixx * dx * dx + 2.0 * ixy * dx * dy + iyy * dy * dy
        gm = jnp.exp(-0.5 * quad)                                      # (K, mt)
        gm_ref[bi] = gm

        # project pooled appearance vectors onto the cj gaussian maps
        av = av_scr[bi]                                                # (K, C)
        num = lax.dot_general(av, gm, (((0,), (0,)), ((), ())),
                              preferred_element_type=jnp.float32)      # (C, mt)
        denom = 1.0 + jnp.sum(gm, axis=0, keepdims=True)               # (1, mt)
        proj = num * pl.reciprocal(denom, approx=True)

        # image decoder stand-in (SPADEGenerator): split matmul + fused tanh
        recon_ref[bi] = jnp.tanh(
            jnp.dot(w_dec_k, gm, preferred_element_type=jnp.float32)
            + jnp.dot(w_dec_c, proj, preferred_element_type=jnp.float32)
            + b_dec)                                                   # (3, mt)


# ----------------------------------------------------------------------------
# Model glue (parameter setup, constant tensors, forward orchestration)
# ----------------------------------------------------------------------------

def make_constants(img_size):
    # half-res grid: arange(-1, 1, 4/img); meshgrid 'ij' -> grid_y rows, grid_x cols
    cr = jnp.arange(-1.0, 1.0, 4.0 / img_size, dtype=jnp.float32)      # len img//2
    h = cr.shape[0]
    gx = jnp.broadcast_to(cr[None, :], (h, h)).reshape(1, -1)
    gy = jnp.broadcast_to(cr[:, None], (h, h)).reshape(1, -1)
    ones = jnp.ones_like(gx)
    zeros = jnp.zeros_like(gx)
    # moment basis (8, N) = [1, gx, gy, gx^2, gx*gy, gy^2, 0, 0]
    G = jnp.concatenate([ones, gx, gy, gx * gx, gx * gy, gy * gy, zeros, zeros],
                        axis=0)
    # full-res (2x) grid packed as one (2, M) array
    cr2 = jnp.arange(-1.0, 1.0, 2.0 / img_size, dtype=jnp.float32)     # len img
    f = cr2.shape[0]
    gx2 = jnp.broadcast_to(cr2[None, :], (f, f)).reshape(1, -1)
    gy2 = jnp.broadcast_to(cr2[:, None], (f, f)).reshape(1, -1)
    grid2 = jnp.concatenate([gx2, gy2], axis=0)
    return G, grid2


def init_params(args, key):
    # TODO(synk): Unet / SPADEGenerator architectures are not defined in the
    #             provided source; stand-in 1x1-conv weights of matching
    #             channel arity are used (weight|bias packed per layer so each
    #             layer is a single constant DMA stream).
    K = args['n_landmarks']
    C = args['n_filters']
    F = args['nsf']                       # shape_encoder.f_filters stand-in
    ks = jax.random.split(key, 3)

    def w(k, shape, scale):
        return scale * jax.random.normal(k, shape, dtype=jnp.float32)

    se_w = w(ks[0], (K + F, 3), 0.5)
    se_b = jnp.zeros((K + F, 1), jnp.float32)
    app_w = w(ks[1], (C, K + F), 0.3)
    app_b = jnp.zeros((C, 1), jnp.float32)
    dec_w = w(ks[2], (3, K + C), 0.3)
    dec_b = jnp.zeros((3, 1), jnp.float32)
    return {
        'se_wb': jnp.concatenate([se_w, se_b], axis=1),      # (K+F, 4)
        'app_wb': jnp.concatenate([app_w, app_b], axis=1),   # (C, K+F+1)
        'dec_wb': jnp.concatenate([dec_w, dec_b], axis=1),   # (3, K+C+1)
    }


def _downsample2x(x_nchw):
    # TODO(synk): Unet's internal downsampling path unknown; plain 2x2 average
    #             pooling (parameter-free) used to reach the half-res grid.
    B, Cc, H, W = x_nchw.shape
    return x_nchw.reshape(B, Cc, H // 2, 2, W // 2, 2).mean(axis=(3, 5))


def _pick_bt(B, cap=8):
    for bt in range(min(B, cap), 0, -1):
        if B % bt == 0:
            return bt
    return 1


def _pick_m_tile(M, cap=8192):
    if M <= cap:
        return M
    t = cap - (cap % 128)
    while t >= 128:
        if M % t == 0:
            return t
        t -= 128
    return M


def _estimate_vmem_bytes(Bt, K, F, C, N, mt):
    f32 = 4
    inputs = (Bt * 3 * 2 * N + 8 * N + 2 * mt
              + (K + F) * 4 + C * (K + F + 1) + 3 * (K + C + 1))
    outputs = Bt * (3 * mt + 2 * K * N + K * mt + 2 * K * 8)
    scratch = Bt * (K * 8 + K * C)
    inter = Bt * ((K + F) * 2 * N + 10 * K * N + C * N
                  + 8 * K * mt + 2 * C * mt + 4 * mt)
    total = (2 * (inputs + outputs) + scratch + inter) * f32   # 2x: double-buffers
    total = int(total * 2)                                     # 2x safety margin
    return max(4 << 20, min(total, 64 << 20))


def part_factorized_forward(params, args, const, color_jittered_input, warped_input):
    """Inputs are NCHW float32: (B, 3, img_size, img_size)."""
    G, grid2 = const
    K = args['n_landmarks']
    C = args['n_filters']
    F = args['nsf']
    img = args['img_size']
    B = warped_input.shape[0]
    N = (img // 2) * (img // 2)
    M = img * img

    cj_x = _downsample2x(color_jittered_input).reshape(B, 3, N)
    w_x = _downsample2x(warped_input).reshape(B, 3, N)
    x_both = jnp.concatenate([cj_x, w_x], axis=-1)              # (B, 3, 2N)

    Bt = _pick_bt(B)
    mt = _pick_m_tile(M)
    n_m = M // mt

    kernel = functools.partial(
        fused_forward_kernel,
        K=K, F=F, C=C, N=N,
        use_identity_covariance=bool(args['use_identity_covariance']),
        fixed_covar=float(args['fixed_covar']),
    )

    outs = pl.pallas_call(
        kernel,
        out_shape=(
            jax.ShapeDtypeStruct((B, 3, M), jnp.float32),       # reconstruction
            jax.ShapeDtypeStruct((B, 2 * K, N), jnp.float32),   # [cj; warped] heatmaps
            jax.ShapeDtypeStruct((B, K, M), jnp.float32),       # cj gauss maps
            jax.ShapeDtypeStruct((B, 2 * K, 8), jnp.float32),   # [cj; warped] packed params
        ),
        grid=(B // Bt, n_m),
        in_specs=[
            pl.BlockSpec((Bt, 3, 2 * N), lambda b, m: (b, 0, 0)),
            pl.BlockSpec((8, N), lambda b, m: (0, 0)),
            pl.BlockSpec((2, mt), lambda b, m: (0, m)),
            pl.BlockSpec((K + F, 4), lambda b, m: (0, 0)),
            pl.BlockSpec((C, K + F + 1), lambda b, m: (0, 0)),
            pl.BlockSpec((3, K + C + 1), lambda b, m: (0, 0)),
        ],
        out_specs=(
            pl.BlockSpec((Bt, 3, mt), lambda b, m: (b, 0, m)),
            pl.BlockSpec((Bt, 2 * K, N), lambda b, m: (b, 0, 0)),
            pl.BlockSpec((Bt, K, mt), lambda b, m: (b, 0, m)),
            pl.BlockSpec((Bt, 2 * K, 8), lambda b, m: (b, 0, 0)),
        ),
        scratch_shapes=[pltpu.VMEM((Bt, K, 8), jnp.float32),
                        pltpu.VMEM((Bt, K, C), jnp.float32)],
        compiler_params=pltpu.CompilerParams(
            dimension_semantics=("parallel", "arbitrary"),
            vmem_limit_bytes=_estimate_vmem_bytes(Bt, K, F, C, N, mt)),
    )(x_both, G, grid2, params['se_wb'], params['app_wb'], params['dec_wb'])

    recon, hm2, cj_gm, p2 = outs
    cj_hm = hm2[:, :K]
    w_hm = hm2[:, K:]

    def unpack(p):
        mu_x = p[:, :, 0:1]
        mu_y = p[:, :, 1:2]
        covar = jnp.stack([p[:, :, 2], p[:, :, 3], p[:, :, 3], p[:, :, 4]],
                          axis=-1).reshape(B, K, 2, 2)
        return mu_x, mu_y, covar

    cj_mux, cj_muy, cj_covar = unpack(p2[:, :K])
    w_mux, w_muy, w_covar = unpack(p2[:, K:])

    hs = img // 2
    return {
        'reconstruction': recon.reshape(B, 3, img, img),
        'vis_centers': (cj_mux, cj_muy),
        'input_a_gauss_params': (cj_mux, cj_muy, cj_covar),
        'input_a_heatmaps': cj_hm.reshape(B, K, hs, hs),
        'input_a_gauss_maps': cj_gm.reshape(B, K, img, img),
        'input_b_gauss_params': (w_mux, w_muy, w_covar),
        'input_b_heatmaps': w_hm.reshape(B, K, hs, hs),
    }
    # TODO(synk): use_fg_bg_mask branch (fg_mask_net / bg_net Unets) omitted;
    #             their architectures are not defined in the provided source.


# ----------------------------------------------------------------------------
# Main
# ----------------------------------------------------------------------------

if __name__ == "__main__":
    args = {
        'n_landmarks': 4,
        'n_filters': 8,
        'nsf': 16,
        'naf': 16,
        'ngc': 32,
        'img_size': 16,
        'use_identity_covariance': False,
        'fixed_covar': 0.1,
        'use_fg_bg_mask': False,
        'low_res_mask': False,
    }

    root = jax.random.PRNGKey(0)
    k_params, k_cj, k_w = jax.random.split(root, 3)

    params = init_params(args, k_params)
    const = make_constants(args['img_size'])

    color_jittered_input = jax.random.normal(
        k_cj, (2, 3, args['img_size'], args['img_size']), dtype=jnp.float32)
    warped_input = jax.random.normal(
        k_w, (2, 3, args['img_size'], args['img_size']), dtype=jnp.float32)

    fwd = jax.jit(functools.partial(part_factorized_forward, params, args, const))
    out = fwd(color_jittered_input, warped_input)
    jax.block_until_ready(out)

    assert out['reconstruction'].shape == (2, 3, 16, 16)
    assert out['input_a_gauss_maps'].shape == (2, 4, 16, 16)
    assert out['input_a_heatmaps'].shape == (2, 4, 8, 8)
    assert out['input_a_gauss_params'][2].shape == (2, 4, 2, 2)
    assert bool(jnp.all(jnp.isfinite(out['reconstruction'])))
    assert bool(jnp.all(jnp.isfinite(out['input_a_gauss_maps'])))
    print("KERNEL_OK")
</pallas_src>

<mosaic_0001>
module attributes {stable_mosaic.version = 11 : i64} {
  func.func @fused_forward_kernel(%arg0: i32, %arg1: i32, %arg2: memref<2x3x128xf32, #tpu.memory_space<vmem>>, %arg3: memref<8x64xf32, #tpu.memory_space<vmem>>, %arg4: memref<2x256xf32, #tpu.memory_space<vmem>>, %arg5: memref<20x4xf32, #tpu.memory_space<vmem>>, %arg6: memref<8x21xf32, #tpu.memory_space<vmem>>, %arg7: memref<3x13xf32, #tpu.memory_space<vmem>>, %arg8: memref<2x3x256xf32, #tpu.memory_space<vmem>>, %arg9: memref<2x8x64xf32, #tpu.memory_space<vmem>>, %arg10: memref<2x4x256xf32, #tpu.memory_space<vmem>>, %arg11: memref<2x8x8xf32, #tpu.memory_space<vmem>>, %arg12: memref<2x4x8xf32, #tpu.memory_space<vmem>>, %arg13: memref<2x4x8xf32, #tpu.memory_space<vmem>>) attributes {dimension_semantics = [#tpu.dimension_semantics<parallel>, #tpu.dimension_semantics<arbitrary>], iteration_bounds = array<i64: 1, 1>, scalar_prefetch = 0 : i64, scratch_operands = 2 : i64, tpu.core_type = #tpu.core_type<tc>, window_params = [{transform_indices = @transform_0, window_bounds = array<i64: 2, 3, 128>}, {pipeline_mode = #tpu.pipeline_mode<synchronous>, transform_indices = @transform_1, window_bounds = array<i64: 8, 64>}, {transform_indices = @transform_2, window_bounds = array<i64: 2, 256>}, {pipeline_mode = #tpu.pipeline_mode<synchronous>, transform_indices = @transform_3, window_bounds = array<i64: 20, 4>}, {pipeline_mode = #tpu.pipeline_mode<synchronous>, transform_indices = @transform_4, window_bounds = array<i64: 8, 21>}, {pipeline_mode = #tpu.pipeline_mode<synchronous>, transform_indices = @transform_5, window_bounds = array<i64: 3, 13>}, {transform_indices = @transform_6, window_bounds = array<i64: 2, 3, 256>}, {transform_indices = @transform_7, window_bounds = array<i64: 2, 8, 64>}, {transform_indices = @transform_8, window_bounds = array<i64: 2, 4, 256>}, {transform_indices = @transform_9, window_bounds = array<i64: 2, 8, 8>}]} {
    %c0_i32 = arith.constant 0 : i32
    %0 = arith.cmpi eq, %arg1, %c0_i32 : i32
    %1 = arith.extui %0 : i1 to i32
    %c0_i32_0 = arith.constant 0 : i32
    %2 = arith.cmpi ne, %1, %c0_i32_0 : i32
    scf.if %2 {
      %c0_42 = arith.constant 0 : index
      %c0_43 = arith.constant 0 : index
      %111 = vector.load %arg3[%c0_42, %c0_43] : memref<8x64xf32, #tpu.memory_space<vmem>>, vector<8x64xf32>
      %c0_44 = arith.constant 0 : index
      %c0_45 = arith.constant 0 : index
      %112 = vector.load %arg5[%c0_44, %c0_45] : memref<20x4xf32, #tpu.memory_space<vmem>>, vector<20x3xf32>
      %c0_46 = arith.constant 0 : index
      %c3 = arith.constant 3 : index
      %113 = vector.load %arg5[%c0_46, %c3] : memref<20x4xf32, #tpu.memory_space<vmem>>, vector<20x1xf32>
      %c0_47 = arith.constant 0 : index
      %c0_48 = arith.constant 0 : index
      %114 = vector.load %arg6[%c0_47, %c0_48] : memref<8x21xf32, #tpu.memory_space<vmem>>, vector<8x4xf32>
      %c0_49 = arith.constant 0 : index
      %c4_50 = arith.constant 4 : index
      %115 = vector.load %arg6[%c0_49, %c4_50] : memref<8x21xf32, #tpu.memory_space<vmem>>, vector<8x16xf32>
      %c0_51 = arith.constant 0 : index
      %c20 = arith.constant 20 : index
      %116 = vector.load %arg6[%c0_51, %c20] : memref<8x21xf32, #tpu.memory_space<vmem>>, vector<8x1xf32>
      %c0_52 = arith.constant 0 : index
      %c0_53 = arith.constant 0 : index
      %c0_54 = arith.constant 0 : index
      %117 = vector.load %arg2[%c0_52, %c0_53, %c0_54] : memref<2x3x128xf32, #tpu.memory_space<vmem>>, vector<1x3x128xf32>
      %118 = vector.shape_cast %117 : vector<1x3x128xf32> to vector<3x128xf32>
      %cst_55 = arith.constant dense<0.000000e+00> : vector<20x128xf32>
      %119 = tpu.matmul %112, %118, %cst_55 {dimension_numbers = #tpu.dot_dimension_numbers<[1], [0], [0], [1], [0, 0, 1, 1], [], []>} : vector<20x3xf32>, vector<3x128xf32>, vector<20x128xf32> -> vector<20x128xf32>
      %120 = vector.broadcast %113 : vector<20x1xf32> to vector<20x128xf32>
      %121 = arith.addf %119, %120 : vector<20x128xf32>
      %122 = vector.extract_strided_slice %121 {offsets = [0, 0], sizes = [4, 64], strides = [1, 1]} : vector<20x128xf32> to vector<4x64xf32>
      %123 = vector.extract_strided_slice %121 {offsets = [0, 64], sizes = [4, 64], strides = [1, 1]} : vector<20x128xf32> to vector<4x64xf32>
      %124 = vector.extract_strided_slice %121 {offsets = [4, 64], sizes = [16, 64], strides = [1, 1]} : vector<20x128xf32> to vector<16x64xf32>
      %cst_56 = arith.constant dense<0xFF800000> : vector<4xf32>
      %125 = vector.multi_reduction <maximumf>, %122, %cst_56 [1] : vector<4x64xf32> to vector<4xf32>
      %126 = vector.shape_cast %125 : vector<4xf32> to vector<4x1xf32>
      %127 = vector.broadcast %126 : vector<4x1xf32> to vector<4x64xf32>
      %128 = arith.subf %122, %127 : vector<4x64xf32>
      %129 = math.exp %128 : vector<4x64xf32>
      %cst_57 = arith.constant dense<0.000000e+00> : vector<4x8xf32>
      %130 = tpu.matmul %129, %111, %cst_57 {dimension_numbers = #tpu.dot_dimension_numbers<[1], [1], [0], [0], [0, 0, 1, 0], [], []>} : vector<4x64xf32>, vector<8x64xf32>, vector<4x8xf32> -> vector<4x8xf32>
      %131 = vector.extract_strided_slice %130 {offsets = [0, 0], sizes = [4, 1], strides = [1, 1]} : vector<4x8xf32> to vector<4x1xf32>
      %132 = tpu.reciprocal %131 {approx = true} : vector<4x1xf32> -> vector<4x1xf32>
      %133 = vector.broadcast %132 : vector<4x1xf32> to vector<4x64xf32>
      %134 = arith.mulf %129, %133 : vector<4x64xf32>
      %135 = vector.extract_strided_slice %130 {offsets = [0, 1], sizes = [4, 1], strides = [1, 1]} : vector<4x8xf32> to vector<4x1xf32>
      %136 = arith.mulf %135, %132 : vector<4x1xf32>
      %137 = vector.extract_strided_slice %130 {offsets = [0, 2], sizes = [4, 1], strides = [1, 1]} : vector<4x8xf32> to vector<4x1xf32>
      %138 = arith.mulf %137, %132 : vector<4x1xf32>
      %139 = vector.extract_strided_slice %130 {offsets = [0, 3], sizes = [4, 1], strides = [1, 1]} : vector<4x8xf32> to vector<4x1xf32>
      %140 = arith.mulf %139, %132 : vector<4x1xf32>
      %141 = arith.mulf %136, %136 : vector<4x1xf32>
      %142 = arith.subf %140, %141 : vector<4x1xf32>
      %cst_58 = arith.constant 0.000000e+00 : f32
      %143 = vector.broadcast %cst_58 : f32 to vector<4x1xf32>
      %144 = arith.maximumf %142, %143 : vector<4x1xf32>
      %cst_59 = arith.constant 9.99999974E-5 : f32
      %145 = vector.broadcast %cst_59 : f32 to vector<4x1xf32>
      %146 = arith.addf %144, %145 : vector<4x1xf32>
      %147 = vector.extract_strided_slice %130 {offsets = [0, 4], sizes = [4, 1], strides = [1, 1]} : vector<4x8xf32> to vector<4x1xf32>
      %148 = arith.mulf %147, %132 : vector<4x1xf32>
      %149 = arith.mulf %136, %138 : vector<4x1xf32>
      %150 = arith.subf %148, %149 : vector<4x1xf32>
      %151 = vector.extract_strided_slice %130 {offsets = [0, 5], sizes = [4, 1], strides = [1, 1]} : vector<4x8xf32> to vector<4x1xf32>
      %152 = arith.mulf %151, %132 : vector<4x1xf32>
      %153 = arith.mulf %138, %138 : vector<4x1xf32>
      %154 = arith.subf %152, %153 : vector<4x1xf32>
      %cst_60 = arith.constant 0.000000e+00 : f32
      %155 = vector.broadcast %cst_60 : f32 to vector<4x1xf32>
      %156 = arith.maximumf %154, %155 : vector<4x1xf32>
      %cst_61 = arith.constant 9.99999974E-5 : f32
      %157 = vector.broadcast %cst_61 : f32 to vector<4x1xf32>
      %158 = arith.addf %156, %157 : vector<4x1xf32>
      %cst_62 = arith.constant dense<0xFF800000> : vector<4xf32>
      %159 = vector.multi_reduction <maximumf>, %123, %cst_62 [1] : vector<4x64xf32> to vector<4xf32>
      %160 = vector.shape_cast %159 : vector<4xf32> to vector<4x1xf32>
      %161 = vector.broadcast %160 : vector<4x1xf32> to vector<4x64xf32>
      %162 = arith.subf %123, %161 : vector<4x64xf32>
      %163 = math.exp %162 : vector<4x64xf32>
      %cst_63 = arith.constant dense<0.000000e+00> : vector<4x8xf32>
      %164 = tpu.matmul %163, %111, %cst_63 {dimension_numbers = #tpu.dot_dimension_numbers<[1], [1], [0], [0], [0, 0, 1, 0], [], []>} : vector<4x64xf32>, vector<8x64xf32>, vector<4x8xf32> -> vector<4x8xf32>
      %165 = vector.extract_strided_slice %164 {offsets = [0, 0], sizes = [4, 1], strides = [1, 1]} : vector<4x8xf32> to vector<4x1xf32>
      %166 = tpu.reciprocal %165 {approx = true} : vector<4x1xf32> -> vector<4x1xf32>
      %167 = vector.broadcast %166 : vector<4x1xf32> to vector<4x64xf32>
      %168 = arith.mulf %163, %167 : vector<4x64xf32>
      %169 = vector.extract_strided_slice %164 {offsets = [0, 1], sizes = [4, 1], strides = [1, 1]} : vector<4x8xf32> to vector<4x1xf32>
      %170 = arith.mulf %169, %166 : vector<4x1xf32>
      %171 = vector.extract_strided_slice %164 {offsets = [0, 2], sizes = [4, 1], strides = [1, 1]} : vector<4x8xf32> to vector<4x1xf32>
      %172 = arith.mulf %171, %166 : vector<4x1xf32>
      %173 = vector.extract_strided_slice %164 {offsets = [0, 3], sizes = [4, 1], strides = [1, 1]} : vector<4x8xf32> to vector<4x1xf32>
      %174 = arith.mulf %173, %166 : vector<4x1xf32>
      %175 = arith.mulf %170, %170 : vector<4x1xf32>
      %176 = arith.subf %174, %175 : vector<4x1xf32>
      %cst_64 = arith.constant 0.000000e+00 : f32
      %177 = vector.broadcast %cst_64 : f32 to vector<4x1xf32>
      %178 = arith.maximumf %176, %177 : vector<4x1xf32>
      %cst_65 = arith.constant 9.99999974E-5 : f32
      %179 = vector.broadcast %cst_65 : f32 to vector<4x1xf32>
      %180 = arith.addf %178, %179 : vector<4x1xf32>
      %181 = vector.extract_strided_slice %164 {offsets = [0, 4], sizes = [4, 1], strides = [1, 1]} : vector<4x8xf32> to vector<4x1xf32>
      %182 = arith.mulf %181, %166 : vector<4x1xf32>
      %183 = arith.mulf %170, %172 : vector<4x1xf32>
      %184 = arith.subf %182, %183 : vector<4x1xf32>
      %185 = vector.extract_strided_slice %164 {offsets = [0, 5], sizes = [4, 1], strides = [1, 1]} : vector<4x8xf32> to vector<4x1xf32>
      %186 = arith.mulf %185, %166 : vector<4x1xf32>
      %187 = arith.mulf %172, %172 : vector<4x1xf32>
      %188 = arith.subf %186, %187 : vector<4x1xf32>
      %cst_66 = arith.constant 0.000000e+00 : f32
      %189 = vector.broadcast %cst_66 : f32 to vector<4x1xf32>
      %190 = arith.maximumf %188, %189 : vector<4x1xf32>
      %cst_67 = arith.constant 9.99999974E-5 : f32
      %191 = vector.broadcast %cst_67 : f32 to vector<4x1xf32>
      %192 = arith.addf %190, %191 : vector<4x1xf32>
      %cst_68 = arith.constant dense<0.000000e+00> : vector<8x64xf32>
      %193 = tpu.matmul %114, %168, %cst_68 {dimension_numbers = #tpu.dot_dimension_numbers<[1], [0], [0], [1], [0, 0, 1, 1], [], []>} : vector<8x4xf32>, vector<4x64xf32>, vector<8x64xf32> -> vector<8x64xf32>
      %cst_69 = arith.constant dense<0.000000e+00> : vector<8x64xf32>
      %194 = tpu.matmul %115, %124, %cst_69 {dimension_numbers = #tpu.dot_dimension_numbers<[1], [0], [0], [1], [0, 0, 1, 1], [], []>} : vector<8x16xf32>, vector<16x64xf32>, vector<8x64xf32> -> vector<8x64xf32>
      %195 = arith.addf %193, %194 : vector<8x64xf32>
      %196 = vector.broadcast %116 : vector<8x1xf32> to vector<8x64xf32>
      %197 = arith.addf %195, %196 : vector<8x64xf32>
      %cst_70 = arith.constant dense<0.000000e+00> : vector<4x8xf32>
      %198 = tpu.matmul %168, %197, %cst_70 {dimension_numbers = #tpu.dot_dimension_numbers<[1], [1], [0], [0], [0, 0, 1, 0], [], []>} : vector<4x64xf32>, vector<8x64xf32>, vector<4x8xf32> -> vector<4x8xf32>
      %cst_71 = arith.constant 1.562500e-02 : f32
      %199 = vector.broadcast %cst_71 : f32 to vector<4x8xf32>
      %200 = arith.mulf %198, %199 : vector<4x8xf32>
      %c0_72 = arith.constant 0 : index
      %c0_73 = arith.constant 0 : index
      %c0_74 = arith.constant 0 : index
      %201 = vector.load %arg13[%c0_72, %c0_73, %c0_74] : memref<2x4x8xf32, #tpu.memory_space<vmem>>, vector<1x4x8xf32>
      %202 = vector.shape_cast %201 : vector<1x4x8xf32> to vector<4x8xf32>
      %203 = vector.shape_cast %200 : vector<4x8xf32> to vector<1x4x8xf32>
      tpu.vector_store %arg13[%c0_72, %c0_73, %c0_74], %203 {strides = array<i32>} : memref<2x4x8xf32, #tpu.memory_space<vmem>>, vector<1x4x8xf32>,
      %204 = arith.mulf %146, %158 : vector<4x1xf32>
      %205 = arith.mulf %150, %150 : vector<4x1xf32>
      %206 = arith.subf %204, %205 : vector<4x1xf32>
      %cst_75 = arith.constant 9.99999997E-7 : f32
      %207 = vector.broadcast %cst_75 : f32 to vector<4x1xf32>
      %208 = arith.addf %206, %207 : vector<4x1xf32>
      %209 = tpu.reciprocal %208 {approx = true} : vector<4x1xf32> -> vector<4x1xf32>
      %210 = arith.mulf %158, %209 : vector<4x1xf32>
      %cst_76 = arith.constant 0.000000e+00 : f32
      %211 = vector.broadcast %cst_76 : f32 to vector<4x1xf32>
      %212 = arith.subf %211, %150 : vector<4x1xf32>
      %213 = arith.mulf %212, %209 : vector<4x1xf32>
      %214 = arith.mulf %146, %209 : vector<4x1xf32>
      %215 = tpu.iota {dimensions = array<i32: 1>} : vector<4x8xi32>
      %cst_77 = arith.constant 0.000000e+00 : f32
      %216 = vector.broadcast %cst_77 : f32 to vector<4x8xf32>
      %c0_i32_78 = arith.constant 0 : i32
      %217 = vector.broadcast %c0_i32_78 : i32 to vector<4x8xi32>
      %218 = arith.cmpi eq, %215, %217 : vector<4x8xi32>
      %219 = vector.shape_cast %136 : vector<4x1xf32> to vector<4x1xf32>
      %220 = vector.broadcast %219 : vector<4x1xf32> to vector<4x8xf32>
      %221 = arith.select %218, %220, %216 : vector<4x8xi1>, vector<4x8xf32>
      %c1_i32 = arith.constant 1 : i32
      %222 = vector.broadcast %c1_i32 : i32 to vector<4x8xi32>
      %223 = arith.cmpi eq, %215, %222 : vector<4x8xi32>
      %224 = vector.shape_cast %138 : vector<4x1xf32> to vector<4x1xf32>
      %225 = vector.broadcast %224 : vector<4x1xf32> to vector<4x8xf32>
      %226 = arith.select %223, %225, %216 : vector<4x8xi1>, vector<4x8xf32>
      %227 = arith.addf %221, %226 : vector<4x8xf32>
      %c2_i32 = arith.constant 2 : i32
      %228 = vector.broadcast %c2_i32 : i32 to vector<4x8xi32>
      %229 = arith.cmpi eq, %215, %228 : vector<4x8xi32>
      %230 = vector.shape_cast %210 : vector<4x1xf32> to vector<4x1xf32>
      %231 = vector.broadcast %230 : vector<4x1xf32> to vector<4x8xf32>
      %232 = arith.select %229, %231, %216 : vector<4x8xi1>, vector<4x8xf32>
      %233 = arith.addf %227, %232 : vector<4x8xf32>
      %c3_i32 = arith.constant 3 : i32
      %234 = vector.broadcast %c3_i32 : i32 to vector<4x8xi32>
      %235 = arith.cmpi eq, %215, %234 : vector<4x8xi32>
      %236 = vector.shape_cast %213 : vector<4x1xf32> to vector<4x1xf32>
      %237 = vector.broadcast %236 : vector<4x1xf32> to vector<4x8xf32>
      %238 = arith.select %235, %237, %216 : vector<4x8xi1>, vector<4x8xf32>
      %239 = arith.addf %233, %238 : vector<4x8xf32>
      %c4_i32 = arith.constant 4 : i32
      %240 = vector.broadcast %c4_i32 : i32 to vector<4x8xi32>
      %241 = arith.cmpi eq, %215, %240 : vector<4x8xi32>
      %242 = vector.shape_cast %214 : vector<4x1xf32> to vector<4x1xf32>
      %243 = vector.broadcast %242 : vector<4x1xf32> to vector<4x8xf32>
      %244 = arith.select %241, %243, %216 : vector<4x8xi1>, vector<4x8xf32>
      %245 = arith.addf %239, %244 : vector<4x8xf32>
      %c0_79 = arith.constant 0 : index
      %c0_80 = arith.constant 0 : index
      %c0_81 = arith.constant 0 : index
      %246 = vector.load %arg12[%c0_79, %c0_80, %c0_81] : memref<2x4x8xf32, #tpu.memory_space<vmem>>, vector<1x4x8xf32>
      %247 = vector.shape_cast %246 : vector<1x4x8xf32> to vector<4x8xf32>
      %248 = vector.shape_cast %245 : vector<4x8xf32> to vector<1x4x8xf32>
      tpu.vector_store %arg12[%c0_79, %c0_80, %c0_81], %248 {strides = array<i32>} : memref<2x4x8xf32, #tpu.memory_space<vmem>>, vector<1x4x8xf32>,
      %c0_82 = arith.constant 0 : index
      %c0_83 = arith.constant 0 : index
      %c0_84 = arith.constant 0 : index
      %249 = vector.load %arg9[%c0_82, %c0_83, %c0_84] : memref<2x8x64xf32, #tpu.memory_space<vmem>>, vector<1x4x64xf32>
      %250 = vector.shape_cast %249 : vector<1x4x64xf32> to vector<4x64xf32>
      %251 = vector.shape_cast %134 : vector<4x64xf32> to vector<1x4x64xf32>
      tpu.vector_store %arg9[%c0_82, %c0_83, %c0_84], %251 {strides = array<i32>} : memref<2x8x64xf32, #tpu.memory_space<vmem>>, vector<1x4x64xf32>,
      %c0_85 = arith.constant 0 : index
      %c4_86 = arith.constant 4 : index
      %c0_87 = arith.constant 0 : index
      %252 = vector.load %arg9[%c0_85, %c4_86, %c0_87] : memref<2x8x64xf32, #tpu.memory_space<vmem>>, vector<1x4x64xf32>
      %253 = vector.shape_cast %252 : vector<1x4x64xf32> to vector<4x64xf32>
      %254 = vector.shape_cast %168 : vector<4x64xf32> to vector<1x4x64xf32>
      tpu.vector_store %arg9[%c0_85, %c4_86, %c0_87], %254 {strides = array<i32>} : memref<2x8x64xf32, #tpu.memory_space<vmem>>, vector<1x4x64xf32>,
      %255 = tpu.iota {dimensions = array<i32: 1>} : vector<4x8xi32>
      %cst_88 = arith.constant 0.000000e+00 : f32
      %256 = vector.broadcast %cst_88 : f32 to vector<4x8xf32>
      %c0_i32_89 = arith.constant 0 : i32
      %257 = vector.broadcast %c0_i32_89 : i32 to vector<4x8xi32>
      %258 = arith.cmpi eq, %255, %257 : vector<4x8xi32>
      %259 = vector.shape_cast %136 : vector<4x1xf32> to vector<4x1xf32>
      %260 = vector.broadcast %259 : vector<4x1xf32> to vector<4x8xf32>
      %261 = arith.select %258, %260, %256 : vector<4x8xi1>, vector<4x8xf32>
      %c1_i32_90 = arith.constant 1 : i32
      %262 = vector.broadcast %c1_i32_90 : i32 to vector<4x8xi32>
      %263 = arith.cmpi eq, %255, %262 : vector<4x8xi32>
      %264 = vector.shape_cast %138 : vector<4x1xf32> to vector<4x1xf32>
      %265 = vector.broadcast %264 : vector<4x1xf32> to vector<4x8xf32>
      %266 = arith.select %263, %265, %256 : vector<4x8xi1>, vector<4x8xf32>
      %267 = arith.addf %261, %266 : vector<4x8xf32>
      %c2_i32_91 = arith.constant 2 : i32
      %268 = vector.broadcast %c2_i32_91 : i32 to vector<4x8xi32>
      %269 = arith.cmpi eq, %255, %268 : vector<4x8xi32>
      %270 = vector.shape_cast %146 : vector<4x1xf32> to vector<4x1xf32>
      %271 = vector.broadcast %270 : vector<4x1xf32> to vector<4x8xf32>
      %272 = arith.select %269, %271, %256 : vector<4x8xi1>, vector<4x8xf32>
      %273 = arith.addf %267, %272 : vector<4x8xf32>
      %c3_i32_92 = arith.constant 3 : i32
      %274 = vector.broadcast %c3_i32_92 : i32 to vector<4x8xi32>
      %275 = arith.cmpi eq, %255, %274 : vector<4x8xi32>
      %276 = vector.shape_cast %150 : vector<4x1xf32> to vector<4x1xf32>
      %277 = vector.broadcast %276 : vector<4x1xf32> to vector<4x8xf32>
      %278 = arith.select %275, %277, %256 : vector<4x8xi1>, vector<4x8xf32>
      %279 = arith.addf %273, %278 : vector<4x8xf32>
      %c4_i32_93 = arith.constant 4 : i32
      %280 = vector.broadcast %c4_i32_93 : i32 to vector<4x8xi32>
      %281 = arith.cmpi eq, %255, %280 : vector<4x8xi32>
      %282 = vector.shape_cast %158 : vector<4x1xf32> to vector<4x1xf32>
      %283 = vector.broadcast %282 : vector<4x1xf32> to vector<4x8xf32>
      %284 = arith.select %281, %283, %256 : vector<4x8xi1>, vector<4x8xf32>
      %285 = arith.addf %279, %284 : vector<4x8xf32>
      %c0_94 = arith.constant 0 : index
      %c0_95 = arith.constant 0 : index
      %c0_96 = arith.constant 0 : index
      %286 = vector.load %arg11[%c0_94, %c0_95, %c0_96] : memref<2x8x8xf32, #tpu.memory_space<vmem>>, vector<1x4x8xf32>
      %287 = vector.shape_cast %286 : vector<1x4x8xf32> to vector<4x8xf32>
      %288 = vector.shape_cast %285 : vector<4x8xf32> to vector<1x4x8xf32>
      tpu.vector_store %arg11[%c0_94, %c0_95, %c0_96], %288 {strides = array<i32>} : memref<2x8x8xf32, #tpu.memory_space<vmem>>, vector<1x4x8xf32>,
      %289 = tpu.iota {dimensions = array<i32: 1>} : vector<4x8xi32>
      %cst_97 = arith.constant 0.000000e+00 : f32
      %290 = vector.broadcast %cst_97 : f32 to vector<4x8xf32>
      %c0_i32_98 = arith.constant 0 : i32
      %291 = vector.broadcast %c0_i32_98 : i32 to vector<4x8xi32>
      %292 = arith.cmpi eq, %289, %291 : vector<4x8xi32>
      %293 = vector.shape_cast %170 : vector<4x1xf32> to vector<4x1xf32>
      %294 = vector.broadcast %293 : vector<4x1xf32> to vector<4x8xf32>
      %295 = arith.select %292, %294, %290 : vector<4x8xi1>, vector<4x8xf32>
      %c1_i32_99 = arith.constant 1 : i32
      %296 = vector.broadcast %c1_i32_99 : i32 to vector<4x8xi32>
      %297 = arith.cmpi eq, %289, %296 : vector<4x8xi32>
      %298 = vector.shape_cast %172 : vector<4x1xf32> to vector<4x1xf32>
      %299 = vector.broadcast %298 : vector<4x1xf32> to vector<4x8xf32>
      %300 = arith.select %297, %299, %290 : vector<4x8xi1>, vector<4x8xf32>
      %301 = arith.addf %295, %300 : vector<4x8xf32>
      %c2_i32_100 = arith.constant 2 : i32
      %302 = vector.broadcast %c2_i32_100 : i32 to vector<4x8xi32>
      %303 = arith.cmpi eq, %289, %302 : vector<4x8xi32>
      %304 = vector.shape_cast %180 : vector<4x1xf32> to vector<4x1xf32>
      %305 = vector.broadcast %304 : vector<4x1xf32> to vector<4x8xf32>
      %306 = arith.select %303, %305, %290 : vector<4x8xi1>, vector<4x8xf32>
      %307 = arith.addf %301, %306 : vector<4x8xf32>
      %c3_i32_101 = arith.constant 3 : i32
      %308 = vector.broadcast %c3_i32_101 : i32 to vector<4x8xi32>
      %309 = arith.cmpi eq, %289, %308 : vector<4x8xi32>
      %310 = vector.shape_cast %184 : vector<4x1xf32> to vector<4x1xf32>
      %311 = vector.broadcast %310 : vector<4x1xf32> to vector<4x8xf32>
      %312 = arith.select %309, %311, %290 : vector<4x8xi1>, vector<4x8xf32>
      %313 = arith.addf %307, %312 : vector<4x8xf32>
      %c4_i32_102 = arith.constant 4 : i32
      %314 = vector.broadcast %c4_i32_102 : i32 to vector<4x8xi32>
      %315 = arith.cmpi eq, %289, %314 : vector<4x8xi32>
      %316 = vector.shape_cast %192 : vector<4x1xf32> to vector<4x1xf32>
      %317 = vector.broadcast %316 : vector<4x1xf32> to vector<4x8xf32>
      %318 = arith.select %315, %317, %290 : vector<4x8xi1>, vector<4x8xf32>
      %319 = arith.addf %313, %318 : vector<4x8xf32>
      %c0_103 = arith.constant 0 : index
      %c4_104 = arith.constant 4 : index
      %c0_105 = arith.constant 0 : index
      %320 = vector.load %arg11[%c0_103, %c4_104, %c0_105] : memref<2x8x8xf32, #tpu.memory_space<vmem>>, vector<1x4x8xf32>
      %321 = vector.shape_cast %320 : vector<1x4x8xf32> to vector<4x8xf32>
      %322 = vector.shape_cast %319 : vector<4x8xf32> to vector<1x4x8xf32>
      tpu.vector_store %arg11[%c0_103, %c4_104, %c0_105], %322 {strides = array<i32>} : memref<2x8x8xf32, #tpu.memory_space<vmem>>, vector<1x4x8xf32>,
      %c1_106 = arith.constant 1 : index
      %c0_107 = arith.constant 0 : index
      %c0_108 = arith.constant 0 : index
      %323 = vector.load %arg2[%c1_106, %c0_107, %c0_108] : memref<2x3x128xf32, #tpu.memory_space<vmem>>, vector<1x3x128xf32>
      %324 = vector.shape_cast %323 : vector<1x3x128xf32> to vector<3x128xf32>
      %cst_109 = arith.constant dense<0.000000e+00> : vector<20x128xf32>
      %325 = tpu.matmul %112, %324, %cst_109 {dimension_numbers = #tpu.dot_dimension_numbers<[1], [0], [0], [1], [0, 0, 1, 1], [], []>} : vector<20x3xf32>, vector<3x128xf32>, vector<20x128xf32> -> vector<20x128xf32>
      %326 = vector.broadcast %113 : vector<20x1xf32> to vector<20x128xf32>
      %327 = arith.addf %325, %326 : vector<20x128xf32>
      %328 = vector.extract_strided_slice %327 {offsets = [0, 0], sizes = [4, 64], strides = [1, 1]} : vector<20x128xf32> to vector<4x64xf32>
      %329 = vector.extract_strided_slice %327 {offsets = [0, 64], sizes = [4, 64], strides = [1, 1]} : vector<20x128xf32> to vector<4x64xf32>
      %330 = vector.extract_strided_slice %327 {offsets = [4, 64], sizes = [16, 64], strides = [1, 1]} : vector<20x128xf32> to vector<16x64xf32>
      %cst_110 = arith.constant dense<0xFF800000> : vector<4xf32>
      %331 = vector.multi_reduction <maximumf>, %328, %cst_110 [1] : vector<4x64xf32> to vector<4xf32>
      %332 = vector.shape_cast %331 : vector<4xf32> to vector<4x1xf32>
      %333 = vector.broadcast %332 : vector<4x1xf32> to vector<4x64xf32>
      %334 = arith.subf %328, %333 : vector<4x64xf32>
      %335 = math.exp %334 : vector<4x64xf32>
      %cst_111 = arith.constant dense<0.000000e+00> : vector<4x8xf32>
      %336 = tpu.matmul %335, %111, %cst_111 {dimension_numbers = #tpu.dot_dimension_numbers<[1], [1], [0], [0], [0, 0, 1, 0], [], []>} : vector<4x64xf32>, vector<8x64xf32>, vector<4x8xf32> -> vector<4x8xf32>
      %337 = vector.extract_strided_slice %336 {offsets = [0, 0], sizes = [4, 1], strides = [1, 1]} : vector<4x8xf32> to vector<4x1xf32>
      %338 = tpu.reciprocal %337 {approx = true} : vector<4x1xf32> -> vector<4x1xf32>
      %339 = vector.broadcast %338 : vector<4x1xf32> to vector<4x64xf32>
      %340 = arith.mulf %335, %339 : vector<4x64xf32>
      %341 = vector.extract_strided_slice %336 {offsets = [0, 1], sizes = [4, 1], strides = [1, 1]} : vector<4x8xf32> to vector<4x1xf32>
      %342 = arith.mulf %341, %338 : vector<4x1xf32>
      %343 = vector.extract_strided_slice %336 {offsets = [0, 2], sizes = [4, 1], strides = [1, 1]} : vector<4x8xf32> to vector<4x1xf32>
      %344 = arith.mulf %343, %338 : vector<4x1xf32>
      %345 = vector.extract_strided_slice %336 {offsets = [0, 3], sizes = [4, 1], strides = [1, 1]} : vector<4x8xf32> to vector<4x1xf32>
      %346 = arith.mulf %345, %338 : vector<4x1xf32>
      %347 = arith.mulf %342, %342 : vector<4x1xf32>
      %348 = arith.subf %346, %347 : vector<4x1xf32>
      %cst_112 = arith.constant 0.000000e+00 : f32
      %349 = vector.broadcast %cst_112 : f32 to vector<4x1xf32>
      %350 = arith.maximumf %348, %349 : vector<4x1xf32>
      %cst_113 = arith.constant 9.99999974E-5 : f32
      %351 = vector.broadcast %cst_113 : f32 to vector<4x1xf32>
      %352 = arith.addf %350, %351 : vector<4x1xf32>
      %353 = vector.extract_strided_slice %336 {offsets = [0, 4], sizes = [4, 1], strides = [1, 1]} : vector<4x8xf32> to vector<4x1xf32>
      %354 = arith.mulf %353, %338 : vector<4x1xf32>
      %355 = arith.mulf %342, %344 : vector<4x1xf32>
      %356 = arith.subf %354, %355 : vector<4x1xf32>
      %357 = vector.extract_strided_slice %336 {offsets = [0, 5], sizes = [4, 1], strides = [1, 1]} : vector<4x8xf32> to vector<4x1xf32>
      %358 = arith.mulf %357, %338 : vector<4x1xf32>
      %359 = arith.mulf %344, %344 : vector<4x1xf32>
      %360 = arith.subf %358, %359 : vector<4x1xf32>
      %cst_114 = arith.constant 0.000000e+00 : f32
      %361 = vector.broadcast %cst_114 : f32 to vector<4x1xf32>
      %362 = arith.maximumf %360, %361 : vector<4x1xf32>
      %cst_115 = arith.constant 9.99999974E-5 : f32
      %363 = vector.broadcast %cst_115 : f32 to vector<4x1xf32>
      %364 = arith.addf %362, %363 : vector<4x1xf32>
      %cst_116 = arith.constant dense<0xFF800000> : vector<4xf32>
      %365 = vector.multi_reduction <maximumf>, %329, %cst_116 [1] : vector<4x64xf32> to vector<4xf32>
      %366 = vector.shape_cast %365 : vector<4xf32> to vector<4x1xf32>
      %367 = vector.broadcast %366 : vector<4x1xf32> to vector<4x64xf32>
      %368 = arith.subf %329, %367 : vector<4x64xf32>
      %369 = math.exp %368 : vector<4x64xf32>
      %cst_117 = arith.constant dense<0.000000e+00> : vector<4x8xf32>
      %370 = tpu.matmul %369, %111, %cst_117 {dimension_numbers = #tpu.dot_dimension_numbers<[1], [1], [0], [0], [0, 0, 1, 0], [], []>} : vector<4x64xf32>, vector<8x64xf32>, vector<4x8xf32> -> vector<4x8xf32>
      %371 = vector.extract_strided_slice %370 {offsets = [0, 0], sizes = [4, 1], strides = [1, 1]} : vector<4x8xf32> to vector<4x1xf32>
      %372 = tpu.reciprocal %371 {approx = true} : vector<4x1xf32> -> vector<4x1xf32>
      %373 = vector.broadcast %372 : vector<4x1xf32> to vector<4x64xf32>
      %374 = arith.mulf %369, %373 : vector<4x64xf32>
      %375 = vector.extract_strided_slice %370 {offsets = [0, 1], sizes = [4, 1], strides = [1, 1]} : vector<4x8xf32> to vector<4x1xf32>
      %376 = arith.mulf %375, %372 : vector<4x1xf32>
      %377 = vector.extract_strided_slice %370 {offsets = [0, 2], sizes = [4, 1], strides = [1, 1]} : vector<4x8xf32> to vector<4x1xf32>
      %378 = arith.mulf %377, %372 : vector<4x1xf32>
      %379 = vector.extract_strided_slice %370 {offsets = [0, 3], sizes = [4, 1], strides = [1, 1]} : vector<4x8xf32> to vector<4x1xf32>
      %380 = arith.mulf %379, %372 : vector<4x1xf32>
      %381 = arith.mulf %376, %376 : vector<4x1xf32>
      %382 = arith.subf %380, %381 : vector<4x1xf32>
      %cst_118 = arith.constant 0.000000e+00 : f32
      %383 = vector.broadcast %cst_118 : f32 to vector<4x1xf32>
      %384 = arith.maximumf %382, %383 : vector<4x1xf32>
      %cst_119 = arith.constant 9.99999974E-5 : f32
      %385 = vector.broadcast %cst_119 : f32 to vector<4x1xf32>
      %386 = arith.addf %384, %385 : vector<4x1xf32>
      %387 = vector.extract_strided_slice %370 {offsets = [0, 4], sizes = [4, 1], strides = [1, 1]} : vector<4x8xf32> to vector<4x1xf32>
      %388 = arith.mulf %387, %372 : vector<4x1xf32>
      %389 = arith.mulf %376, %378 : vector<4x1xf32>
      %390 = arith.subf %388, %389 : vector<4x1xf32>
      %391 = vector.extract_strided_slice %370 {offsets = [0, 5], sizes = [4, 1], strides = [1, 1]} : vector<4x8xf32> to vector<4x1xf32>
      %392 = arith.mulf %391, %372 : vector<4x1xf32>
      %393 = arith.mulf %378, %378 : vector<4x1xf32>
      %394 = arith.subf %392, %393 : vector<4x1xf32>
      %cst_120 = arith.constant 0.000000e+00 : f32
      %395 = vector.broadcast %cst_120 : f32 to vector<4x1xf32>
      %396 = arith.maximumf %394, %395 : vector<4x1xf32>
      %cst_121 = arith.constant 9.99999974E-5 : f32
      %397 = vector.broadcast %cst_121 : f32 to vector<4x1xf32>
      %398 = arith.addf %396, %397 : vector<4x1xf32>
      %cst_122 = arith.constant dense<0.000000e+00> : vector<8x64xf32>
      %399 = tpu.matmul %114, %374, %cst_122 {dimension_numbers = #tpu.dot_dimension_numbers<[1], [0], [0], [1], [0, 0, 1, 1], [], []>} : vector<8x4xf32>, vector<4x64xf32>, vector<8x64xf32> -> vector<8x64xf32>
      %cst_123 = arith.constant dense<0.000000e+00> : vector<8x64xf32>
      %400 = tpu.matmul %115, %330, %cst_123 {dimension_numbers = #tpu.dot_dimension_numbers<[1], [0], [0], [1], [0, 0, 1, 1], [], []>} : vector<8x16xf32>, vector<16x64xf32>, vector<8x64xf32> -> vector<8x64xf32>
      %401 = arith.addf %399, %400 : vector<8x64xf32>
      %402 = vector.broadcast %116 : vector<8x1xf32> to vector<8x64xf32>
      %403 = arith.addf %401, %402 : vector<8x64xf32>
      %cst_124 = arith.constant dense<0.000000e+00> : vector<4x8xf32>
      %404 = tpu.matmul %374, %403, %cst_124 {dimension_numbers = #tpu.dot_dimension_numbers<[1], [1], [0], [0], [0, 0, 1, 0], [], []>} : vector<4x64xf32>, vector<8x64xf32>, vector<4x8xf32> -> vector<4x8xf32>
      %cst_125 = arith.constant 1.562500e-02 : f32
      %405 = vector.broadcast %cst_125 : f32 to vector<4x8xf32>
      %406 = arith.mulf %404, %405 : vector<4x8xf32>
      %c1_126 = arith.constant 1 : index
      %c0_127 = arith.constant 0 : index
      %c0_128 = arith.constant 0 : index
      %407 = vector.load %arg13[%c1_126, %c0_127, %c0_128] : memref<2x4x8xf32, #tpu.memory_space<vmem>>, vector<1x4x8xf32>
      %408 = vector.shape_cast %407 : vector<1x4x8xf32> to vector<4x8xf32>
      %409 = vector.shape_cast %406 : vector<4x8xf32> to vector<1x4x8xf32>
      tpu.vector_store %arg13[%c1_126, %c0_127, %c0_128], %409 {strides = array<i32>} : memref<2x4x8xf32, #tpu.memory_space<vmem>>, vector<1x4x8xf32>,
      %410 = arith.mulf %352, %364 : vector<4x1xf32>
      %411 = arith.mulf %356, %356 : vector<4x1xf32>
      %412 = arith.subf %410, %411 : vector<4x1xf32>
      %cst_129 = arith.constant 9.99999997E-7 : f32
      %413 = vector.broadcast %cst_129 : f32 to vector<4x1xf32>
      %414 = arith.addf %412, %413 : vector<4x1xf32>
      %415 = tpu.reciprocal %414 {approx = true} : vector<4x1xf32> -> vector<4x1xf32>
      %416 = arith.mulf %364, %415 : vector<4x1xf32>
      %cst_130 = arith.constant 0.000000e+00 : f32
      %417 = vector.broadcast %cst_130 : f32 to vector<4x1xf32>
      %418 = arith.subf %417, %356 : vector<4x1xf32>
      %419 = arith.mulf %418, %415 : vector<4x1xf32>
      %420 = arith.mulf %352, %415 : vector<4x1xf32>
      %421 = tpu.iota {dimensions = array<i32: 1>} : vector<4x8xi32>
      %cst_131 = arith.constant 0.000000e+00 : f32
      %422 = vector.broadcast %cst_131 : f32 to vector<4x8xf32>
      %c0_i32_132 = arith.constant 0 : i32
      %423 = vector.broadcast %c0_i32_132 : i32 to vector<4x8xi32>
      %424 = arith.cmpi eq, %421, %423 : vector<4x8xi32>
      %425 = vector.shape_cast %342 : vector<4x1xf32> to vector<4x1xf32>
      %426 = vector.broadcast %425 : vector<4x1xf32> to vector<4x8xf32>
      %427 = arith.select %424, %426, %422 : vector<4x8xi1>, vector<4x8xf32>
      %c1_i32_133 = arith.constant 1 : i32
      %428 = vector.broadcast %c1_i32_133 : i32 to vector<4x8xi32>
      %429 = arith.cmpi eq, %421, %428 : vector<4x8xi32>
      %430 = vector.shape_cast %344 : vector<4x1xf32> to vector<4x1xf32>
      %431 = vector.broadcast %430 : vector<4x1xf32> to vector<4x8xf32>
      %432 = arith.select %429, %431, %422 : vector<4x8xi1>, vector<4x8xf32>
      %433 = arith.addf %427, %432 : vector<4x8xf32>
      %c2_i32_134 = arith.constant 2 : i32
      %434 = vector.broadcast %c2_i32_134 : i32 to vector<4x8xi32>
      %435 = arith.cmpi eq, %421, %434 : vector<4x8xi32>
      %436 = vector.shape_cast %416 : vector<4x1xf32> to vector<4x1xf32>
      %437 = vector.broadcast %436 : vector<4x1xf32> to vector<4x8xf32>
      %438 = arith.select %435, %437, %422 : vector<4x8xi1>, vector<4x8xf32>
      %439 = arith.addf %433, %438 : vector<4x8xf32>
      %c3_i32_135 = arith.constant 3 : i32
      %440 = vector.broadcast %c3_i32_135 : i32 to vector<4x8xi32>
      %441 = arith.cmpi eq, %421, %440 : vector<4x8xi32>
      %442 = vector.shape_cast %419 : vector<4x1xf32> to vector<4x1xf32>
      %443 = vector.broadcast %442 : vector<4x1xf32> to vector<4x8xf32>
      %444 = arith.select %441, %443, %422 : vector<4x8xi1>, vector<4x8xf32>
      %445 = arith.addf %439, %444 : vector<4x8xf32>
      %c4_i32_136 = arith.constant 4 : i32
      %446 = vector.broadcast %c4_i32_136 : i32 to vector<4x8xi32>
      %447 = arith.cmpi eq, %421, %446 : vector<4x8xi32>
      %448 = vector.shape_cast %420 : vector<4x1xf32> to vector<4x1xf32>
      %449 = vector.broadcast %448 : vector<4x1xf32> to vector<4x8xf32>
      %450 = arith.select %447, %449, %422 : vector<4x8xi1>, vector<4x8xf32>
      %451 = arith.addf %445, %450 : vector<4x8xf32>
      %c1_137 = arith.constant 1 : index
      %c0_138 = arith.constant 0 : index
      %c0_139 = arith.constant 0 : index
      %452 = vector.load %arg12[%c1_137, %c0_138, %c0_139] : memref<2x4x8xf32, #tpu.memory_space<vmem>>, vector<1x4x8xf32>
      %453 = vector.shape_cast %452 : vector<1x4x8xf32> to vector<4x8xf32>
      %454 = vector.shape_cast %451 : vector<4x8xf32> to vector<1x4x8xf32>
      tpu.vector_store %arg12[%c1_137, %c0_138, %c0_139], %454 {strides = array<i32>} : memref<2x4x8xf32, #tpu.memory_space<vmem>>, vector<1x4x8xf32>,
      %c1_140 = arith.constant 1 : index
      %c0_141 = arith.constant 0 : index
      %c0_142 = arith.constant 0 : index
      %455 = vector.load %arg9[%c1_140, %c0_141, %c0_142] : memref<2x8x64xf32, #tpu.memory_space<vmem>>, vector<1x4x64xf32>
      %456 = vector.shape_cast %455 : vector<1x4x64xf32> to vector<4x64xf32>
      %457 = vector.shape_cast %340 : vector<4x64xf32> to vector<1x4x64xf32>
      tpu.vector_store %arg9[%c1_140, %c0_141, %c0_142], %457 {strides = array<i32>} : memref<2x8x64xf32, #tpu.memory_space<vmem>>, vector<1x4x64xf32>,
      %c1_143 = arith.constant 1 : index
      %c4_144 = arith.constant 4 : index
      %c0_145 = arith.constant 0 : index
      %458 = vector.load %arg9[%c1_143, %c4_144, %c0_145] : memref<2x8x64xf32, #tpu.memory_space<vmem>>, vector<1x4x64xf32>
      %459 = vector.shape_cast %458 : vector<1x4x64xf32> to vector<4x64xf32>
      %460 = vector.shape_cast %374 : vector<4x64xf32> to vector<1x4x64xf32>
      tpu.vector_store %arg9[%c1_143, %c4_144, %c0_145], %460 {strides = array<i32>} : memref<2x8x64xf32, #tpu.memory_space<vmem>>, vector<1x4x64xf32>,
      %461 = tpu.iota {dimensions = array<i32: 1>} : vector<4x8xi32>
      %cst_146 = arith.constant 0.000000e+00 : f32
      %462 = vector.broadcast %cst_146 : f32 to vector<4x8xf32>
      %c0_i32_147 = arith.constant 0 : i32
      %463 = vector.broadcast %c0_i32_147 : i32 to vector<4x8xi32>
      %464 = arith.cmpi eq, %461, %463 : vector<4x8xi32>
      %465 = vector.shape_cast %342 : vector<4x1xf32> to vector<4x1xf32>
      %466 = vector.broadcast %465 : vector<4x1xf32> to vector<4x8xf32>
      %467 = arith.select %464, %466, %462 : vector<4x8xi1>, vector<4x8xf32>
      %c1_i32_148 = arith.constant 1 : i32
      %468 = vector.broadcast %c1_i32_148 : i32 to vector<4x8xi32>
      %469 = arith.cmpi eq, %461, %468 : vector<4x8xi32>
      %470 = vector.shape_cast %344 : vector<4x1xf32> to vector<4x1xf32>
      %471 = vector.broadcast %470 : vector<4x1xf32> to vector<4x8xf32>
      %472 = arith.select %469, %471, %462 : vector<4x8xi1>, vector<4x8xf32>
      %473 = arith.addf %467, %472 : vector<4x8xf32>
      %c2_i32_149 = arith.constant 2 : i32
      %474 = vector.broadcast %c2_i32_149 : i32 to vector<4x8xi32>
      %475 = arith.cmpi eq, %461, %474 : vector<4x8xi32>
      %476 = vector.shape_cast %352 : vector<4x1xf32> to vector<4x1xf32>
      %477 = vector.broadcast %476 : vector<4x1xf32> to vector<4x8xf32>
      %478 = arith.select %475, %477, %462 : vector<4x8xi1>, vector<4x8xf32>
      %479 = arith.addf %473, %478 : vector<4x8xf32>
      %c3_i32_150 = arith.constant 3 : i32
      %480 = vector.broadcast %c3_i32_150 : i32 to vector<4x8xi32>
      %481 = arith.cmpi eq, %461, %480 : vector<4x8xi32>
      %482 = vector.shape_cast %356 : vector<4x1xf32> to vector<4x1xf32>
      %483 = vector.broadcast %482 : vector<4x1xf32> to vector<4x8xf32>
      %484 = arith.select %481, %483, %462 : vector<4x8xi1>, vector<4x8xf32>
      %485 = arith.addf %479, %484 : vector<4x8xf32>
      %c4_i32_151 = arith.constant 4 : i32
      %486 = vector.broadcast %c4_i32_151 : i32 to vector<4x8xi32>
      %487 = arith.cmpi eq, %461, %486 : vector<4x8xi32>
      %488 = vector.shape_cast %364 : vector<4x1xf32> to vector<4x1xf32>
      %489 = vector.broadcast %488 : vector<4x1xf32> to vector<4x8xf32>
      %490 = arith.select %487, %489, %462 : vector<4x8xi1>, vector<4x8xf32>
      %491 = arith.addf %485, %490 : vector<4x8xf32>
      %c1_152 = arith.constant 1 : index
      %c0_153 = arith.constant 0 : index
      %c0_154 = arith.constant 0 : index
      %492 = vector.load %arg11[%c1_152, %c0_153, %c0_154] : memref<2x8x8xf32, #tpu.memory_space<vmem>>, vector<1x4x8xf32>
      %493 = vector.shape_cast %492 : vector<1x4x8xf32> to vector<4x8xf32>
      %494 = vector.shape_cast %491 : vector<4x8xf32> to vector<1x4x8xf32>
      tpu.vector_store %arg11[%c1_152, %c0_153, %c0_154], %494 {strides = array<i32>} : memref<2x8x8xf32, #tpu.memory_space<vmem>>, vector<1x4x8xf32>,
      %495 = tpu.iota {dimensions = array<i32: 1>} : vector<4x8xi32>
      %cst_155 = arith.constant 0.000000e+00 : f32
      %496 = vector.broadcast %cst_155 : f32 to vector<4x8xf32>
      %c0_i32_156 = arith.constant 0 : i32
      %497 = vector.broadcast %c0_i32_156 : i32 to vector<4x8xi32>
      %498 = arith.cmpi eq, %495, %497 : vector<4x8xi32>
      %499 = vector.shape_cast %376 : vector<4x1xf32> to vector<4x1xf32>
      %500 = vector.broadcast %499 : vector<4x1xf32> to vector<4x8xf32>
      %501 = arith.select %498, %500, %496 : vector<4x8xi1>, vector<4x8xf32>
      %c1_i32_157 = arith.constant 1 : i32
      %502 = vector.broadcast %c1_i32_157 : i32 to vector<4x8xi32>
      %503 = arith.cmpi eq, %495, %502 : vector<4x8xi32>
      %504 = vector.shape_cast %378 : vector<4x1xf32> to vector<4x1xf32>
      %505 = vector.broadcast %504 : vector<4x1xf32> to vector<4x8xf32>
      %506 = arith.select %503, %505, %496 : vector<4x8xi1>, vector<4x8xf32>
      %507 = arith.addf %501, %506 : vector<4x8xf32>
      %c2_i32_158 = arith.constant 2 : i32
      %508 = vector.broadcast %c2_i32_158 : i32 to vector<4x8xi32>
      %509 = arith.cmpi eq, %495, %508 : vector<4x8xi32>
      %510 = vector.shape_cast %386 : vector<4x1xf32> to vector<4x1xf32>
      %511 = vector.broadcast %510 : vector<4x1xf32> to vector<4x8xf32>
      %512 = arith.select %509, %511, %496 : vector<4x8xi1>, vector<4x8xf32>
      %513 = arith.addf %507, %512 : vector<4x8xf32>
      %c3_i32_159 = arith.constant 3 : i32
      %514 = vector.broadcast %c3_i32_159 : i32 to vector<4x8xi32>
      %515 = arith.cmpi eq, %495, %514 : vector<4x8xi32>
      %516 = vector.shape_cast %390 : vector<4x1xf32> to vector<4x1xf32>
      %517 = vector.broadcast %516 : vector<4x1xf32> to vector<4x8xf32>
      %518 = arith.select %515, %517, %496 : vector<4x8xi1>, vector<4x8xf32>
      %519 = arith.addf %513, %518 : vector<4x8xf32>
      %c4_i32_160 = arith.constant 4 : i32
      %520 = vector.broadcast %c4_i32_160 : i32 to vector<4x8xi32>
      %521 = arith.cmpi eq, %495, %520 : vector<4x8xi32>
      %522 = vector.shape_cast %398 : vector<4x1xf32> to vector<4x1xf32>
      %523 = vector.broadcast %522 : vector<4x1xf32> to vector<4x8xf32>
      %524 = arith.select %521, %523, %496 : vector<4x8xi1>, vector<4x8xf32>
      %525 = arith.addf %519, %524 : vector<4x8xf32>
      %c1_161 = arith.constant 1 : index
      %c4_162 = arith.constant 4 : index
      %c0_163 = arith.constant 0 : index
      %526 = vector.load %arg11[%c1_161, %c4_162, %c0_163] : memref<2x8x8xf32, #tpu.memory_space<vmem>>, vector<1x4x8xf32>
      %527 = vector.shape_cast %526 : vector<1x4x8xf32> to vector<4x8xf32>
      %528 = vector.shape_cast %525 : vector<4x8xf32> to vector<1x4x8xf32>
      tpu.vector_store %arg11[%c1_161, %c4_162, %c0_163], %528 {strides = array<i32>} : memref<2x8x8xf32, #tpu.memory_space<vmem>>, vector<1x4x8xf32>,
    } else {
    }
    %c0 = arith.constant 0 : index
    %c0_1 = arith.constant 0 : index
    %3 = vector.load %arg4[%c0, %c0_1] : memref<2x256xf32, #tpu.memory_space<vmem>>, vector<2x256xf32>
    %4 = vector.extract_strided_slice %3 {offsets = [0, 0], sizes = [1, 256], strides = [1, 1]} : vector<2x256xf32> to vector<1x256xf32>
    %5 = vector.extract_strided_slice %3 {offsets = [1, 0], sizes = [1, 256], strides = [1, 1]} : vector<2x256xf32> to vector<1x256xf32>
    %c0_2 = arith.constant 0 : index
    %c0_3 = arith.constant 0 : index
    %6 = vector.load %arg7[%c0_2, %c0_3] : memref<3x13xf32, #tpu.memory_space<vmem>>, vector<3x4xf32>
    %c0_4 = arith.constant 0 : index
    %c4 = arith.constant 4 : index
    %7 = vector.load %arg7[%c0_4, %c4] : memref<3x13xf32, #tpu.memory_space<vmem>>, vector<3x8xf32>
    %c0_5 = arith.constant 0 : index
    %c12 = arith.constant 12 : index
    %8 = vector.load %arg7[%c0_5, %c12] : memref<3x13xf32, #tpu.memory_space<vmem>>, vector<3x1xf32>
    %c0_6 = arith.constant 0 : index
    %c0_7 = arith.constant 0 : index
    %c0_8 = arith.constant 0 : index
    %9 = vector.load %arg12[%c0_6, %c0_7, %c0_8] : memref<2x4x8xf32, #tpu.memory_space<vmem>>, vector<1x4x8xf32>
    %10 = vector.shape_cast %9 : vector<1x4x8xf32> to vector<4x8xf32>
    %11 = vector.extract_strided_slice %10 {offsets = [0, 0], sizes = [4, 1], strides = [1, 1]} : vector<4x8xf32> to vector<4x1xf32>
    %12 = vector.extract_strided_slice %10 {offsets = [0, 1], sizes = [4, 1], strides = [1, 1]} : vector<4x8xf32> to vector<4x1xf32>
    %13 = vector.extract_strided_slice %10 {offsets = [0, 2], sizes = [4, 1], strides = [1, 1]} : vector<4x8xf32> to vector<4x1xf32>
    %14 = vector.extract_strided_slice %10 {offsets = [0, 3], sizes = [4, 1], strides = [1, 1]} : vector<4x8xf32> to vector<4x1xf32>
    %15 = vector.extract_strided_slice %10 {offsets = [0, 4], sizes = [4, 1], strides = [1, 1]} : vector<4x8xf32> to vector<4x1xf32>
    %16 = vector.broadcast %4 : vector<1x256xf32> to vector<4x256xf32>
    %17 = vector.broadcast %11 : vector<4x1xf32> to vector<4x256xf32>
    %18 = arith.subf %16, %17 : vector<4x256xf32>
    %19 = vector.broadcast %5 : vector<1x256xf32> to vector<4x256xf32>
    %20 = vector.broadcast %12 : vector<4x1xf32> to vector<4x256xf32>
    %21 = arith.subf %19, %20 : vector<4x256xf32>
    %22 = vector.broadcast %13 : vector<4x1xf32> to vector<4x256xf32>
    %23 = arith.mulf %22, %18 : vector<4x256xf32>
    %24 = arith.mulf %23, %18 : vector<4x256xf32>
    %cst = arith.constant 2.000000e+00 : f32
    %25 = vector.broadcast %cst : f32 to vector<4x1xf32>
    %26 = arith.mulf %25, %14 : vector<4x1xf32>
    %27 = vector.broadcast %26 : vector<4x1xf32> to vector<4x256xf32>
    %28 = arith.mulf %27, %18 : vector<4x256xf32>
    %29 = arith.mulf %28, %21 : vector<4x256xf32>
    %30 = arith.addf %24, %29 : vector<4x256xf32>
    %31 = vector.broadcast %15 : vector<4x1xf32> to vector<4x256xf32>
    %32 = arith.mulf %31, %21 : vector<4x256xf32>
    %33 = arith.mulf %32, %21 : vector<4x256xf32>
    %34 = arith.addf %30, %33 : vector<4x256xf32>
    %cst_9 = arith.constant -5.000000e-01 : f32
    %35 = vector.broadcast %cst_9 : f32 to vector<4x256xf32>
    %36 = arith.mulf %35, %34 : vector<4x256xf32>
    %37 = math.exp %36 : vector<4x256xf32>
    %c0_10 = arith.constant 0 : index
    %c0_11 = arith.constant 0 : index
    %c0_12 = arith.constant 0 : index
    %38 = vector.load %arg10[%c0_10, %c0_11, %c0_12] : memref<2x4x256xf32, #tpu.memory_space<vmem>>, vector<1x4x256xf32>
    %39 = vector.shape_cast %38 : vector<1x4x256xf32> to vector<4x256xf32>
    %40 = vector.shape_cast %37 : vector<4x256xf32> to vector<1x4x256xf32>
    tpu.vector_store %arg10[%c0_10, %c0_11, %c0_12], %40 {strides = array<i32>} : memref<2x4x256xf32, #tpu.memory_space<vmem>>, vector<1x4x256xf32>,
    %c0_13 = arith.constant 0 : index
    %c0_14 = arith.constant 0 : index
    %c0_15 = arith.constant 0 : index
    %41 = vector.load %arg13[%c0_13, %c0_14, %c0_15] : memref<2x4x8xf32, #tpu.memory_space<vmem>>, vector<1x4x8xf32>
    %42 = vector.shape_cast %41 : vector<1x4x8xf32> to vector<4x8xf32>
    %cst_16 = arith.constant dense<0.000000e+00> : vector<8x256xf32>
    %43 = tpu.matmul %42, %37, %cst_16 {dimension_numbers = #tpu.dot_dimension_numbers<[0], [0], [1], [1], [0, 1, 1, 1], [], []>} : vector<4x8xf32>, vector<4x256xf32>, vector<8x256xf32> -> vector<8x256xf32>
    %cst_17 = arith.constant dense<0.000000e+00> : vector<256xf32>
    %44 = vector.multi_reduction <add>, %37, %cst_17 [0] : vector<4x256xf32> to vector<256xf32>
    %45 = vector.shape_cast %44 : vector<256xf32> to vector<1x256xf32>
    %cst_18 = arith.constant 1.000000e+00 : f32
    %46 = vector.broadcast %cst_18 : f32 to vector<1x256xf32>
    %47 = arith.addf %46, %45 : vector<1x256xf32>
    %48 = tpu.reciprocal %47 {approx = true} : vector<1x256xf32> -> vector<1x256xf32>
    %49 = vector.broadcast %48 : vector<1x256xf32> to vector<8x256xf32>
    %50 = arith.mulf %43, %49 : vector<8x256xf32>
    %cst_19 = arith.constant dense<0.000000e+00> : vector<3x256xf32>
    %51 = tpu.matmul %6, %37, %cst_19 {dimension_numbers = #tpu.dot_dimension_numbers<[1], [0], [0], [1], [0, 0, 1, 1], [], []>} : vector<3x4xf32>, vector<4x256xf32>, vector<3x256xf32> -> vector<3x256xf32>
    %cst_20 = arith.constant dense<0.000000e+00> : vector<3x256xf32>
    %52 = tpu.matmul %7, %50, %cst_20 {dimension_numbers = #tpu.dot_dimension_numbers<[1], [0], [0], [1], [0, 0, 1, 1], [], []>} : vector<3x8xf32>, vector<8x256xf32>, vector<3x256xf32> -> vector<3x256xf32>
    %53 = arith.addf %51, %52 : vector<3x256xf32>
    %54 = vector.broadcast %8 : vector<3x1xf32> to vector<3x256xf32>
    %55 = arith.addf %53, %54 : vector<3x256xf32>
    %56 = math.tanh %55 : vector<3x256xf32>
    %c0_21 = arith.constant 0 : index
    %c0_22 = arith.constant 0 : index
    %c0_23 = arith.constant 0 : index
    %57 = vector.load %arg8[%c0_21, %c0_22, %c0_23] : memref<2x3x256xf32, #tpu.memory_space<vmem>>, vector<1x3x256xf32>
    %58 = vector.shape_cast %57 : vector<1x3x256xf32> to vector<3x256xf32>
    %59 = vector.shape_cast %56 : vector<3x256xf32> to vector<1x3x256xf32>
    tpu.vector_store %arg8[%c0_21, %c0_22, %c0_23], %59 {strides = array<i32>} : memref<2x3x256xf32, #tpu.memory_space<vmem>>, vector<1x3x256xf32>,
    %c1 = arith.constant 1 : index
    %c0_24 = arith.constant 0 : index
    %c0_25 = arith.constant 0 : index
    %60 = vector.load %arg12[%c1, %c0_24, %c0_25] : memref<2x4x8xf32, #tpu.memory_space<vmem>>, vector<1x4x8xf32>
    %61 = vector.shape_cast %60 : vector<1x4x8xf32> to vector<4x8xf32>
    %62 = vector.extract_strided_slice %61 {offsets = [0, 0], sizes = [4, 1], strides = [1, 1]} : vector<4x8xf32> to vector<4x1xf32>
    %63 = vector.extract_strided_slice %61 {offsets = [0, 1], sizes = [4, 1], strides = [1, 1]} : vector<4x8xf32> to vector<4x1xf32>
    %64 = vector.extract_strided_slice %61 {offsets = [0, 2], sizes = [4, 1], strides = [1, 1]} : vector<4x8xf32> to vector<4x1xf32>
    %65 = vector.extract_strided_slice %61 {offsets = [0, 3], sizes = [4, 1], strides = [1, 1]} : vector<4x8xf32> to vector<4x1xf32>
    %66 = vector.extract_strided_slice %61 {offsets = [0, 4], sizes = [4, 1], strides = [1, 1]} : vector<4x8xf32> to vector<4x1xf32>
    %67 = vector.broadcast %4 : vector<1x256xf32> to vector<4x256xf32>
    %68 = vector.broadcast %62 : vector<4x1xf32> to vector<4x256xf32>
    %69 = arith.subf %67, %68 : vector<4x256xf32>
    %70 = vector.broadcast %5 : vector<1x256xf32> to vector<4x256xf32>
    %71 = vector.broadcast %63 : vector<4x1xf32> to vector<4x256xf32>
    %72 = arith.subf %70, %71 : vector<4x256xf32>
    %73 = vector.broadcast %64 : vector<4x1xf32> to vector<4x256xf32>
    %74 = arith.mulf %73, %69 : vector<4x256xf32>
    %75 = arith.mulf %74, %69 : vector<4x256xf32>
    %cst_26 = arith.constant 2.000000e+00 : f32
    %76 = vector.broadcast %cst_26 : f32 to vector<4x1xf32>
    %77 = arith.mulf %76, %65 : vector<4x1xf32>
    %78 = vector.broadcast %77 : vector<4x1xf32> to vector<4x256xf32>
    %79 = arith.mulf %78, %69 : vector<4x256xf32>
    %80 = arith.mulf %79, %72 : vector<4x256xf32>
    %81 = arith.addf %75, %80 : vector<4x256xf32>
    %82 = vector.broadcast %66 : vector<4x1xf32> to vector<4x256xf32>
    %83 = arith.mulf %82, %72 : vector<4x256xf32>
    %84 = arith.mulf %83, %72 : vector<4x256xf32>
    %85 = arith.addf %81, %84 : vector<4x256xf32>
    %cst_27 = arith.constant -5.000000e-01 : f32
    %86 = vector.broadcast %cst_27 : f32 to vector<4x256xf32>
    %87 = arith.mulf %86, %85 : vector<4x256xf32>
    %88 = math.exp %87 : vector<4x256xf32>
    %c1_28 = arith.constant 1 : index
    %c0_29 = arith.constant 0 : index
    %c0_30 = arith.constant 0 : index
    %89 = vector.load %arg10[%c1_28, %c0_29, %c0_30] : memref<2x4x256xf32, #tpu.memory_space<vmem>>, vector<1x4x256xf32>
    %90 = vector.shape_cast %89 : vector<1x4x256xf32> to vector<4x256xf32>
    %91 = vector.shape_cast %88 : vector<4x256xf32> to vector<1x4x256xf32>
    tpu.vector_store %arg10[%c1_28, %c0_29, %c0_30], %91 {strides = array<i32>} : memref<2x4x256xf32, #tpu.memory_space<vmem>>, vector<1x4x256xf32>,
    %c1_31 = arith.constant 1 : index
    %c0_32 = arith.constant 0 : index
    %c0_33 = arith.constant 0 : index
    %92 = vector.load %arg13[%c1_31, %c0_32, %c0_33] : memref<2x4x8xf32, #tpu.memory_space<vmem>>, vector<1x4x8xf32>
    %93 = vector.shape_cast %92 : vector<1x4x8xf32> to vector<4x8xf32>
    %cst_34 = arith.constant dense<0.000000e+00> : vector<8x256xf32>
    %94 = tpu.matmul %93, %88, %cst_34 {dimension_numbers = #tpu.dot_dimension_numbers<[0], [0], [1], [1], [0, 1, 1, 1], [], []>} : vector<4x8xf32>, vector<4x256xf32>, vector<8x256xf32> -> vector<8x256xf32>
    %cst_35 = arith.constant dense<0.000000e+00> : vector<256xf32>
    %95 = vector.multi_reduction <add>, %88, %cst_35 [0] : vector<4x256xf32> to vector<256xf32>
    %96 = vector.shape_cast %95 : vector<256xf32> to vector<1x256xf32>
    %cst_36 = arith.constant 1.000000e+00 : f32
    %97 = vector.broadcast %cst_36 : f32 to vector<1x256xf32>
    %98 = arith.addf %97, %96 : vector<1x256xf32>
    %99 = tpu.reciprocal %98 {approx = true} : vector<1x256xf32> -> vector<1x256xf32>
    %100 = vector.broadcast %99 : vector<1x256xf32> to vector<8x256xf32>
    %101 = arith.mulf %94, %100 : vector<8x256xf32>
    %cst_37 = arith.constant dense<0.000000e+00> : vector<3x256xf32>
    %102 = tpu.matmul %6, %88, %cst_37 {dimension_numbers = #tpu.dot_dimension_numbers<[1], [0], [0], [1], [0, 0, 1, 1], [], []>} : vector<3x4xf32>, vector<4x256xf32>, vector<3x256xf32> -> vector<3x256xf32>
    %cst_38 = arith.constant dense<0.000000e+00> : vector<3x256xf32>
    %103 = tpu.matmul %7, %101, %cst_38 {dimension_numbers = #tpu.dot_dimension_numbers<[1], [0], [0], [1], [0, 0, 1, 1], [], []>} : vector<3x8xf32>, vector<8x256xf32>, vector<3x256xf32> -> vector<3x256xf32>
    %104 = arith.addf %102, %103 : vector<3x256xf32>
    %105 = vector.broadcast %8 : vector<3x1xf32> to vector<3x256xf32>
    %106 = arith.addf %104, %105 : vector<3x256xf32>
    %107 = math.tanh %106 : vector<3x256xf32>
    %c1_39 = arith.constant 1 : index
    %c0_40 = arith.constant 0 : index
    %c0_41 = arith.constant 0 : index
    %108 = vector.load %arg8[%c1_39, %c0_40, %c0_41] : memref<2x3x256xf32, #tpu.memory_space<vmem>>, vector<1x3x256xf32>
    %109 = vector.shape_cast %108 : vector<1x3x256xf32> to vector<3x256xf32>
    %110 = vector.shape_cast %107 : vector<3x256xf32> to vector<1x3x256xf32>
    tpu.vector_store %arg8[%c1_39, %c0_40, %c0_41], %110 {strides = array<i32>} : memref<2x3x256xf32, #tpu.memory_space<vmem>>, vector<1x3x256xf32>,
    return
  }
  func.func @transform_0(%arg0: i32, %arg1: i32) -> (i32, i32, i32) {
    %c0_i32 = arith.constant 0 : i32
    %c0_i32_0 = arith.constant 0 : i32
    %c0_i32_1 = arith.constant 0 : i32
    return %arg0, %c0_i32, %c0_i32_0 : i32, i32, i32
  }
  func.func @transform_1(%arg0: i32, %arg1: i32) -> (i32, i32) {
    %c0_i32 = arith.constant 0 : i32
    %c0_i32_0 = arith.constant 0 : i32
    %c0_i32_1 = arith.constant 0 : i32
    return %c0_i32, %c0_i32_0 : i32, i32
  }
  func.func @transform_2(%arg0: i32, %arg1: i32) -> (i32, i32) {
    %c0_i32 = arith.constant 0 : i32
    %c0_i32_0 = arith.constant 0 : i32
    return %c0_i32, %arg1 : i32, i32
  }
  func.func @transform_3(%arg0: i32, %arg1: i32) -> (i32, i32) {
    %c0_i32 = arith.constant 0 : i32
    %c0_i32_0 = arith.constant 0 : i32
    %c0_i32_1 = arith.constant 0 : i32
    return %c0_i32, %c0_i32_0 : i32, i32
  }
  func.func @transform_4(%arg0: i32, %arg1: i32) -> (i32, i32) {
    %c0_i32 = arith.constant 0 : i32
    %c0_i32_0 = arith.constant 0 : i32
    %c0_i32_1 = arith.constant 0 : i32
    return %c0_i32, %c0_i32_0 : i32, i32
  }
  func.func @transform_5(%arg0: i32, %arg1: i32) -> (i32, i32) {
    %c0_i32 = arith.constant 0 : i32
    %c0_i32_0 = arith.constant 0 : i32
    %c0_i32_1 = arith.constant 0 : i32
    return %c0_i32, %c0_i32_0 : i32, i32
  }
  func.func @transform_6(%arg0: i32, %arg1: i32) -> (i32, i32, i32) {
    %c0_i32 = arith.constant 0 : i32
    %c0_i32_0 = arith.constant 0 : i32
    return %arg0, %c0_i32, %arg1 : i32, i32, i32
  }
  func.func @transform_7(%arg0: i32, %arg1: i32) -> (i32, i32, i32) {
    %c0_i32 = arith.constant 0 : i32
    %c0_i32_0 = arith.constant 0 : i32
    %c0_i32_1 = arith.constant 0 : i32
    return %arg0, %c0_i32, %c0_i32_0 : i32, i32, i32
  }
  func.func @transform_8(%arg0: i32, %arg1: i32) -> (i32, i32, i32) {
    %c0_i32 = arith.constant 0 : i32
    %c0_i32_0 = arith.constant 0 : i32
    return %arg0, %c0_i32, %arg1 : i32, i32, i32
  }
  func.func @transform_9(%arg0: i32, %arg1: i32) -> (i32, i32, i32) {
    %c0_i32 = arith.constant 0 : i32
    %c0_i32_0 = arith.constant 0 : i32
    %c0_i32_1 = arith.constant 0 : i32
    return %arg0, %c0_i32, %c0_i32_0 : i32, i32, i32
  }
}

</mosaic_0001>

<bundles_post_ra>
// kernel: part_factorized_forward.1
= control target key start
LH: loop header
LB: loop body
LE: loop exit
PB: predicated region body
PF: predicated region fallthrough
CT: control target
= control target key end

     0   :  { %vm59_vm0 = vcmask 1042432   ;;  %vm52_vm1 = vcmask 23552   ;;  %v2526_v0 = vmov 0.0   ;;  %vm2527_vm2 = vmmov 0   ;;  %s2531_s20 = smov 124   ;;  %s2536_s25 = smov 5   ;;  %s3158_s0 = inlined_call_operand.vmem [shape: f32[2,3,128], index: 0, kind: input, shape index: {}]   ;;  %s3159_s3 = inlined_call_operand.vmem [shape: f32[20,4], index: 3, kind: input, shape index: {}]   ;;  %s3160_s1 = inlined_call_operand.vmem [shape: f32[8,64], index: 1, kind: input, shape index: {}]   ;;  %s3161_s4 = inlined_call_operand.vmem [shape: f32[8,21], index: 4, kind: input, shape index: {}]   ;;  %s3162_s7 = inlined_call_operand.vmem [shape: f32[2,8,64], index: 7, kind: output, shape index: {1}]   ;;  %s3163_s5 = inlined_call_operand.vmem [shape: f32[3,13], index: 5, kind: input, shape index: {}]   ;;  %s3164_s2 = inlined_call_operand.vmem [shape: f32[2,256], index: 2, kind: input, shape index: {}]   ;;  %s3165_s8 = inlined_call_operand.vmem [shape: f32[2,4,256], index: 8, kind: output, shape index: {2}]   ;;  %s3166_s9 = inlined_call_operand.vmem [shape: f32[2,8,8], index: 9, kind: output, shape index: {3}]   ;;  %s3167_s6 = inlined_call_operand.vmem [shape: f32[2,3,256], index: 6, kind: output, shape index: {0}]  }
   0x1   :  { %2322 = vmatprep.subr.mxu0 %v2526_v0  ;;  %v36_v1 = vld [vmem:[%s3158_s0] sm:$0x7]  ;;  %2324 = vmatprep.mubr.msk.f32.mxu0 %vm2527_vm2, %v2526_v0  ;;  %v2528_v3 = vmov 3   ;;  %vm280_vm3 = vcmask 1043968   ;;  %vm143_vm4 = vcmask 519168   ;;  %vm150_vm5 = vcmask 523264  }
   0x2   :  { %v2605_v2 = vld [vmem:[%s3159_s3] sm:$0xff]  ;;  %2323 = vmatpush3.msk.msra.mxu0 %vm59_vm0, %v36_v1  ;;  %2430 = vset.pattern.permute.xlu0 %v2528_v3  ;;  %v2632_v10 = vld [vmem:[%s3159_s3 + $0x10] sm:$0xf]  ;;  %v2530_v23 = vmov 0   ;;  %v33_v24 = vld [vmem:[%s3159_s3 + $0x8] sm:$0xff]  ;;  %vm421_vm6 = vcmask 1043456  }
   0x3   :  { %2325 = vmatmul.mubr.msk.f32.vlgmr.msra.gmra.mrb[0].mxu0 %vm52_vm1, %v2605_v2  ;;  %39 = vperm.xlu0 %2430, %v2605_v2   ;;  %v2639_v11 = vld [vmem:[%s3160_s1] sm:$0xff]  ;;  %s2529_s1 = smov 64   ;;  %vm509_vm7 = vcmask 31744   ;;  %v2532_v39 = vmov 0.0|0.0   ;;  %v2533_v48 = vmov 20   ;;  %vm433_vm8 = vcmask 130048  }
   0x4   :  { %2404 = vmatprep.subr.mxu1 %v2526_v0  ;;  %2330 = vmatprep.mubr.msk.f32.mxu1 %vm2527_vm2, %v2526_v0  ;;  %v2681_v34 = vld [vmem:[%s3161_s4] sm:$0xff]  ;;  %vm665_vm9 = vcmask 60416   ;;  %s2535_s4 = smov 1   ;;  %s2537_s26 = smov 4   ;;  %vm1728_vm15 = vcmask 64512  }
   0x5   :  { %2405 = vmatpush3.msk.msra.mxu1 %vm59_vm0, %v36_v1  ;;  %2327 = vmatprep.mubr.msk.f32.mxu0 %vm2527_vm2, %v2526_v0  ;;  %v2258_v35 = vld [vmem:[%s3158_s0 + $0x4] sm:$0x7]  ;;  %s2534_s0 = smov 2   ;;  %s2538_s29 = smov 127  }
   0x6   :  { %2333 = vmatprep.subr.mxu1 %v2526_v0  ;;  %2350 = vmatprep.subr.mxu0 %v2526_v0  ;;  %s2539_s30 = smov 3   ;;  %s2540_s10 = smov 126  }
   0x7   :  { %2331 = vmatmul.mubr.msk.f32.vlgmr.msra.gmra.mrb[0].mxu1 %vm52_vm1, %v2632_v10  ;;  %2431 = vset.pattern.permute.xlu1 %v2530_v23 }
   0x8   :  { %2335 = vmatprep.mubr.msk.f32.mxu1 %vm2527_vm2, %v2526_v0  ;;  %2328 = vmatmul.mubr.msk.f32.gmra.mrb[2].mxu0 %vm52_vm1, %v33_v24 }
   0x9   :  { %2352 = vmatprep.mubr.msk.f32.mxu0 %vm2527_vm2, %v2526_v0 }
   0xc   :  { %2334 = vmatpush3.xpose.msk.msra.mxu1 %vm150_vm5, %v2639_v11 }
   0xd   :  { %2338 = vmatprep.subr.mxu1 %v2526_v0 }
  0x82   :  { %v2620_v4 = vpop.permute.xlu0 %39 }
  0xd6   :  { %v129_v5 = vpop.f32.mrb[0].mxu0 }
  0xd7   :  { %v2623_v6 = vadd.f32 %v129_v5, %v2620_v4  ;;  %v2326_v7 = vpop.f32.mrb[1].mxu0 }
  0xd9   :  { %v281_v8 = vsel %vm280_vm3, %v2623_v6, -inf  ;;  %v144_v9 = vsel %vm143_vm4, %v2623_v6, -inf  ;;  %v422_v44 = vrot.slane %v2623_v6, 4 }
  0xda   :  { %282 = vmax.xlane.f32.xlu0 %v281_v8  ;;  %145 = vmax.xlane.f32.xlu1 %v144_v9  ;;  %v139_v20 = vpop.f32.mrb[0].mxu1 }
  0xdb   :  { %v2332_v21 = vpop.f32.mrb[1].mxu1  ;;  %v134_v32 = vpop.f32.mrb[2].mxu0 }
  0xdc   :  { %v2329_v33 = vpop.f32.mrb[3].mxu0 }
 0x167   :  { %v283_v12 = vpop.xlane.xlu0 %282  ;;  %v146_v13 = vpop.xlane.xlu1 %145 }
 0x168   :  { %v284_v14 = vsub.f32 %v2623_v6, %v283_v12  ;;  %v147_v15 = vsub.f32 %v2623_v6, %v146_v13 }
 0x16a   :  { %v285_v16 = vmul.f32 1.442695, %v284_v14  ;;  %v148_v17 = vmul.f32 1.442695, %v147_v15 }
 0x16c   :  { %2482 = vpow2.f32 %v285_v16 }
 0x16d   :  { %2484 = vpow2.f32 %v148_v17 }
 0x176   :  { %v2483_v18 = vpop.eup %2482 }
 0x177   :  { %v2648_v19 = vpop.eup %2484  ;;  %288 = vrot.lane.b32.xlu1 %v2483_v18, %s2529_s1 }
 0x178   :  { %2336 = vmatmul.mubr.msk.f32.vlgmr.msra.gmra.mrb[2].mxu1 %vm150_vm5, %v2648_v19 }
 0x179   :  { %2339 = vmatpush3.xpose.msk.msra.mxu1 %vm150_vm5, %v2639_v11  ;;  %2340 = vmatprep.mubr.msk.f32.mxu1 %vm2527_vm2, %v2526_v0 }
 0x17a   :  { %2398 = vmatprep.subr.bf16.mxu1 %v2532_v39 }
 0x1e9   :  { %v289_v22 = vpop.permute.xlu1 %288 }
 0x1ea   :  { %2341 = vmatmul.mubr.msk.f32.vlgmr.msra.gmra.mrb[4].mxu1 %vm150_vm5, %v289_v22 }
 0x1eb   :  { %2347 = vmatprep.mubr.msk.f32.mxu1 %vm2527_vm2, %v2526_v0 }
 0x24b   :  { %v2665_v25 = vpop.f32.mrb[2].mxu1 }
 0x24c   :  { %v2337_v26 = vpop.f32.mrb[3].mxu1 }
 0x2bd   :  { %v2669_v27 = vpop.f32.mrb[4].mxu1 }
 0x2be   :  { %2486 = vrcp.f32 %v2669_v27  ;;  %v2342_v28 = vpop.f32.mrb[5].mxu1 }
 0x2c8   :  { %v2672_v29 = vpop.eup %2486 }
 0x2c9   :  { %365 = vperm.xlu1 %2431, %v2672_v29  }
 0x2cd   :  { %2432 = vset.pattern.permute.xlu1 %v2528_v3 }
 0x348   :  { %v366_v30 = vpop.permute.xlu1 %365 }
 0x349   :  { %v368_v31 = vmul.f32 %v2483_v18, %v366_v30 }
 0x34b   :  { %507 = vrot.lane.b32.xlu1 %v368_v31, %s2529_s1 }
 0x34f   :  { %44 = vperm.xlu1 %2432, %v33_v24  }
 0x353   :  { %49 = vperm.xlu1 %2432, %v2632_v10  }
 0x357   :  { %416 = vrot.lane.b32.xlu1 %v2681_v34, %s2531_s20 }
 0x358   :  { %2438 = vset.pattern.permute.xlu1 %v2533_v48 }
 0x3bd   :  { %v2688_v36 = vpop.permute.xlu1 %507 }
 0x3be   :  { %734 = vst.msk [vmem:[%s3162_s7 + $0x4] sm:$0xf] %vm143_vm4, %v2688_v36  ;;  %2351 = vmatpush3.msk.msra.mxu0 %vm421_vm6, %v2688_v36 }
 0x3bf   :  { %2353 = vmatmul.mubr.msk.f32.vlgmr.msra.gmra.mrb[4].mxu0 %vm509_vm7, %v2681_v34  ;;  %2360 = vmatprep.subr.mxu0 %v2526_v0 }
 0x3c0   :  { %2361 = vmatpush3.msk.msra.mxu0 %vm59_vm0, %v2258_v35  ;;  %2362 = vmatprep.mubr.msk.f32.mxu0 %vm2527_vm2, %v2526_v0 }
 0x3c1   :  { %2388 = vmatprep.subr.mxu0 %v2526_v0 }
 0x3c3   :  { %2363 = vmatmul.mubr.msk.f32.vlgmr.msra.gmra.mrb[6].mxu0 %vm52_vm1, %v2605_v2 }
 0x3c4   :  { %2365 = vmatprep.mubr.msk.f32.mxu0 %vm2527_vm2, %v2526_v0 }
 0x3c7   :  { %2366 = vmatmul.mubr.msk.f32.gmra.mrb[8].mxu0 %vm52_vm1, %v33_v24 }
 0x3c8   :  { %2368 = vmatprep.mubr.msk.f32.mxu0 %vm2527_vm2, %v2526_v0 }
 0x3cb   :  { %2369 = vmatmul.mubr.msk.f32.gmra.mrb[10].mxu0 %vm52_vm1, %v2632_v10 }
 0x3cc   :  { %2390 = vmatprep.mubr.msk.f32.mxu0 %vm2527_vm2, %v2526_v0 }
 0x3ce   :  { %v45_v37 = vpop.permute.xlu1 %44 }
 0x3cf   :  { %v135_v38 = vadd.f32 %v134_v32, %v45_v37 }
 0x3d1   :  { %v423_v41 = vrot.slane %v135_v38, 4 }
 0x3d2   :  { %v50_v40 = vpop.permute.xlu1 %49 }
 0x3d3   :  { %v140_v42 = vadd.f32 %v139_v20, %v50_v40  ;;  %v424_v45 = vsel %vm421_vm6, %v422_v44, %v423_v41 }
 0x3d5   :  { %v425_v43 = vrot.slane %v140_v42, 4 }
 0x3d6   :  { %v2720_v53 = vpop.permute.xlu1 %416 }
 0x3d7   :  { %v426_v46 = vsel %vm421_vm6, %v423_v41, %v425_v43 }
 0x3d8   :  { %v2433_v47 = vpack.i.bf16 %v426_v46, %v424_v45 }
 0x3da   :  { %2434 = vrot.lane.b32.xlu0 %v2433_v47, %s2529_s1 }
 0x44c   :  { %v2435_v49 = vpop.permute.xlu0 %2434 }
 0x44d   :  { %v2437_v50 = vunpack.i.h.bf16 %v2435_v49  ;;  %v2436_v51 = vunpack.i.l.bf16 %v2435_v49 }
 0x44f   :  { %v2399_v52 = vpack.c.bf16 %v2437_v50, %v2436_v51 }
 0x451   :  { %2400 = vmatpush3.bf16.msra.mxu1 %v2399_v52 }
 0x452   :  { %2355 = vmatprep.subr.mxu1 %v2526_v0 }
 0x454   :  { %2348 = vmatmul.mubr.msk.f32.vlgmr.msra.gmra.mrb[6].mxu1 %vm433_vm8, %v2720_v53 }
 0x455   :  { %2357 = vmatprep.mubr.msk.f32.mxu1 %vm2527_vm2, %v2526_v0 }
 0x492   :  { %v580_v54 = vpop.f32.mrb[4].mxu0 }
 0x493   :  { %v2354_v55 = vpop.f32.mrb[5].mxu0 }
 0x496   :  { %v861_v56 = vpop.f32.mrb[6].mxu0 }
 0x497   :  { %v862_v57 = vadd.f32 %v861_v56, %v2620_v4  ;;  %v2364_v58 = vpop.f32.mrb[7].mxu0 }
 0x499   :  { %v1007_v59 = vsel %vm280_vm3, %v862_v57, -inf  ;;  %v875_v60 = vsel %vm143_vm4, %v862_v57, -inf  ;;  %v1144_v8 = vrot.slane %v862_v57, 4 }
 0x49a   :  { %1008 = vmax.xlane.f32.xlu1 %v1007_v59  ;;  %876 = vmax.xlane.f32.xlu0 %v875_v60  ;;  %v866_v61 = vpop.f32.mrb[8].mxu0 }
 0x49b   :  { %v867_v62 = vadd.f32 %v866_v61, %v45_v37  ;;  %v2367_v63 = vpop.f32.mrb[9].mxu0 }
 0x49d   :  { %v1145_v2 = vrot.slane %v867_v62, 4 }
 0x49e   :  { %v871_v1 = vpop.f32.mrb[10].mxu0 }
 0x49f   :  { %v872_v5 = vadd.f32 %v871_v1, %v50_v40  ;;  %v2370_v6 = vpop.f32.mrb[11].mxu0  ;;  %v1146_v9 = vsel %vm421_vm6, %v1144_v8, %v1145_v2 }
 0x4a1   :  { %v1147_v7 = vrot.slane %v872_v5, 4 }
 0x4a3   :  { %v1148_v4 = vsel %vm421_vm6, %v1145_v2, %v1147_v7 }
 0x4a4   :  { %v2440_v10 = vpack.i.bf16 %v1148_v4, %v1146_v9 }
 0x4ab   :  { %585 = vperm.xlu1 %2438, %v2681_v34  }
 0x4af   :  { %2439 = vset.pattern.permute.xlu1 %v2530_v23 }
 0x527   :  { %v502_v12 = vpop.f32.mrb[6].mxu1  ;;  %v1009_v13 = vpop.xlane.xlu1 %1008 }
 0x528   :  { %v581_v14 = vadd.f32 %v580_v54, %v502_v12  ;;  %v1010_v15 = vsub.f32 %v862_v57, %v1009_v13  ;;  %v877_v16 = vpop.xlane.xlu0 %876  ;;  %v2349_v17 = vpop.f32.mrb[7].mxu1 }
 0x529   :  { %v878_v18 = vsub.f32 %v862_v57, %v877_v16 }
 0x52a   :  { %v1011_v20 = vmul.f32 1.442695, %v1010_v15 }
 0x52b   :  { %v879_v21 = vmul.f32 1.442695, %v878_v18  ;;  %v2734_v22 = vpop.permute.xlu1 %585 }
 0x52c   :  { %2488 = vpow2.f32 %v1011_v20  ;;  %v588_v24 = vadd.f32 %v2734_v22, %v581_v14 }
 0x52d   :  { %2490 = vpow2.f32 %v879_v21 }
 0x52e   :  { %2356 = vmatpush3.xpose.msk.msra.mxu1 %vm150_vm5, %v588_v24 }
 0x52f   :  { %2371 = vmatprep.subr.mxu1 %v2526_v0 }
 0x531   :  { %2358 = vmatmul.mubr.msk.f32.vlgmr.msra.gmra.mrb[8].mxu1 %vm150_vm5, %v2688_v36 }
 0x532   :  { %2372 = vmatpush3.xpose.msk.msra.mxu1 %vm150_vm5, %v2639_v11  ;;  %2373 = vmatprep.mubr.msk.f32.mxu1 %vm2527_vm2, %v2526_v0 }
 0x533   :  { %2376 = vmatprep.subr.mxu1 %v2526_v0 }
 0x536   :  { %v2489_v26 = vpop.eup %2488 }
 0x537   :  { %v2746_v28 = vpop.eup %2490  ;;  %1014 = vrot.lane.b32.xlu0 %v2489_v26, %s2529_s1 }
 0x538   :  { %2374 = vmatmul.mubr.msk.f32.vlgmr.msra.gmra.mrb[10].mxu1 %vm150_vm5, %v2746_v28 }
 0x539   :  { %2377 = vmatpush3.xpose.msk.msra.mxu1 %vm150_vm5, %v2639_v11  ;;  %2378 = vmatprep.mubr.msk.f32.mxu1 %vm2527_vm2, %v2526_v0 }
 0x53a   :  { %2401 = vmatprep.subr.bf16.mxu1 %v2532_v39 }
 0x5a9   :  { %v1015_v30 = vpop.permute.xlu0 %1014 }
 0x5aa   :  { %2379 = vmatmul.mubr.msk.f32.vlgmr.msra.gmra.mrb[12].mxu1 %vm150_vm5, %v1015_v30 }
 0x5ab   :  { %2385 = vmatprep.mubr.msk.f32.mxu1 %vm2527_vm2, %v2526_v0 }
 0x604   :  { %v660_v31 = vpop.f32.mrb[8].mxu1 }
 0x605   :  { %v664_v32 = vmul.f32 0.015625, %v660_v31  ;;  %v2359_v33 = vpop.f32.mrb[9].mxu1 }
 0x607   :  { %666 = vst.msk [vmem:[#allocation3] sm:$0xf] %vm665_vm9, %v664_v32 }
 0x60b   :  { %v2760_v35 = vpop.f32.mrb[10].mxu1 }
 0x60c   :  { %2492 = vrcp.f32 %v2760_v35  ;;  %v2375_v11 = vpop.f32.mrb[11].mxu1 }
 0x616   :  { %v2763_v36 = vpop.eup %2492 }
 0x617   :  { %965 = vrot.lane.b32.xlu0 %v2763_v36, %s2534_s0 }
 0x67d   :  { %v2767_v37 = vpop.f32.mrb[12].mxu1 }
 0x67e   :  { %2494 = vrcp.f32 %v2767_v37  ;;  %v2380_v38 = vpop.f32.mrb[13].mxu1 }
 0x67f   :  { %2496 = vrcp.f32 %v2665_v25 }
 0x688   :  { %v2770_v39 = vpop.eup %2494 }
 0x689   :  { %1091 = vperm.xlu1 %2439, %v2770_v39   ;;  %v2776_v45 = vpop.eup %2496  ;;  %v966_v50 = vpop.permute.xlu0 %965 }
 0x68a   :  { %v2807_v51 = vmul.f32 %v966_v50, %v2760_v35 }
 0x68c   :  { %v999_v52 = vmul.f32 %v2807_v51, %v2807_v51 }
 0x68d   :  { %2441 = vrot.lane.b32.xlu1 %v2440_v10, %s2529_s1 }
 0x708   :  { %v1092_v40 = vpop.permute.xlu1 %1091 }
 0x709   :  { %v1094_v41 = vmul.f32 %v2489_v26, %v1092_v40  ;;  %v2541_v40 = vmov 2  }
 0x70a   :  { %2446 = vset.pattern.permute.xlu0 %v2541_v40 }
 0x70b   :  { %1226 = vrot.lane.b32.xlu1 %v1094_v41, %s2529_s1  ;;  %v2542_v41 = vmov 1  }
 0x70c   :  { %v2442_v42 = vpop.permute.xlu1 %2441  ;;  %2445 = vset.pattern.permute.xlu1 %v2542_v41 }
 0x70d   :  { %v2444_v43 = vunpack.i.h.bf16 %v2442_v42  ;;  %v2443_v44 = vunpack.i.l.bf16 %v2442_v42 }
 0x70f   :  { %v2402_v46 = vpack.c.bf16 %v2444_v43, %v2443_v44  ;;  %238 = vrot.lane.b32.xlu1 %v2776_v45, %s2534_s0 }
 0x711   :  { %2403 = vmatpush3.bf16.msra.mxu1 %v2402_v46 }
 0x712   :  { %2393 = vmatprep.subr.mxu1 %v2526_v0 }
 0x713   :  { %234 = vrot.lane.b32.xlu1 %v2776_v45, %s2535_s4 }
 0x714   :  { %2386 = vmatmul.mubr.msk.f32.vlgmr.msra.gmra.mrb[14].mxu1 %vm433_vm8, %v2720_v53 }
 0x715   :  { %2395 = vmatprep.mubr.msk.f32.mxu1 %vm2527_vm2, %v2526_v0 }
 0x717   :  { %961 = vrot.lane.b32.xlu1 %v2763_v36, %s2535_s4 }
 0x71b   :  { %268 = vrot.lane.b32.xlu1 %v2776_v45, %s2536_s25 }
 0x71f   :  { %254 = vrot.lane.b32.xlu1 %v2776_v45, %s2537_s26 }
 0x77d   :  { %v1227_v47 = vpop.permute.xlu1 %1226 }
 0x77e   :  { %2273 = vst.msk [vmem:[%s3162_s7 + $0xc] sm:$0xf] %vm143_vm4, %v1227_v47  ;;  %2389 = vmatpush3.msk.msra.mxu0 %vm421_vm6, %v1227_v47 }
 0x77f   :  { %2391 = vmatmul.mubr.msk.f32.vlgmr.msra.gmra.mrb[12].mxu0 %vm509_vm7, %v2681_v34 }
 0x780   :  { %1698 = vmatprep.mubr.f32.mxu0 %v2526_v0 }
 0x781   :  { %v239_v48 = vpop.permute.xlu1 %238 }
 0x782   :  { %v2802_v49 = vmul.f32 %v239_v48, %v2665_v25 }
 0x784   :  { %259 = vrot.lane.b32.xlu0 %v2802_v49, %s2538_s29  ;;  %v272_v34 = vmul.f32 %v2802_v49, %v2802_v49 }
 0x785   :  { %v235_v55 = vpop.permute.xlu1 %234 }
 0x786   :  { %v2820_v57 = vmul.f32 %v235_v55, %v2665_v25 }
 0x788   :  { %986 = vrot.lane.b32.xlu0 %v2807_v51, %s2538_s29  ;;  %v246_v6 = vmul.f32 %v2820_v57, %v2820_v57 }
 0x789   :  { %v962_v56 = vpop.permute.xlu1 %961 }
 0x78a   :  { %v2824_v60 = vmul.f32 %v962_v56, %v2760_v35 }
 0x78c   :  { %274 = vrot.lane.b32.xlu0 %v272_v34, %s2539_s30  ;;  %v973_v9 = vmul.f32 %v2824_v60, %v2824_v60 }
 0x78d   :  { %v269_v61 = vpop.permute.xlu1 %268 }
 0x78e   :  { %v271_v1 = vmul.f32 %v269_v61, %v2665_v25 }
 0x790   :  { %995 = vrot.lane.b32.xlu0 %v2763_v36, %s2536_s25 }
 0x791   :  { %v255_v21 = vpop.permute.xlu1 %254 }
 0x792   :  { %v257_v24 = vmul.f32 %v255_v21, %v2665_v25 }
 0x794   :  { %1001 = vrot.lane.b32.xlu0 %v999_v52, %s2539_s30 }
 0x7e7   :  { %v1221_v53 = vpop.f32.mrb[14].mxu1 }
 0x7e8   :  { %v2387_v54 = vpop.f32.mrb[15].mxu1 }
 0x7f6   :  { %v260_v58 = vpop.permute.xlu0 %259 }
 0x7f7   :  { %v262_v59 = vmul.f32 %v260_v58, %v2820_v57 }
 0x7f9   :  { %264 = vrot.lane.b32.xlu1 %v262_v59, %s2539_s30 }
 0x7fa   :  { %v987_v62 = vpop.permute.xlu0 %986 }
 0x7fb   :  { %v989_v63 = vmul.f32 %v987_v62, %v2824_v60 }
 0x7fd   :  { %981 = vrot.lane.b32.xlu1 %v2763_v36, %s2537_s26  ;;  %991 = vrot.lane.b32.xlu0 %v989_v63, %s2539_s30 }
 0x7fe   :  { %v275_v2 = vpop.permute.xlu0 %274 }
 0x7ff   :  { %v277_v5 = vsub.f32 %v271_v1, %v275_v2 }
 0x801   :  { %242 = vrot.lane.b32.xlu1 %v2776_v45, %s2539_s30  ;;  %248 = vrot.lane.b32.xlu0 %v246_v6, %s2534_s0  ;;  %v278_v8 = vmax.f32 %v277_v5, 0.0 }
 0x802   :  { %v996_v7 = vpop.permute.xlu0 %995 }
 0x803   :  { %v998_v4 = vmul.f32 %v996_v7, %v2760_v35  ;;  %v2843_v12 = vadd.f32 0.0001, %v278_v8  ;;  %v2543_v7 = vmov 5  }
 0x805   :  { %969 = vrot.lane.b32.xlu1 %v2763_v36, %s2539_s30  ;;  %975 = vrot.lane.b32.xlu0 %v973_v9, %s2534_s0 }
 0x806   :  { %v1002_v10 = vpop.permute.xlu0 %1001 }
 0x807   :  { %v1004_v13 = vsub.f32 %v998_v4, %v1002_v10 }
 0x809   :  { %v1005_v14 = vmax.f32 %v1004_v13, 0.0  ;;  %668 = vrot.lane.b32.xlu1 %v2843_v12, %s2540_s10 }
 0x80b   :  { %v2846_v15 = vadd.f32 0.0001, %v1005_v14 }
 0x80d   :  { %1380 = vrot.lane.b32.xlu1 %v2846_v15, %s2540_s10 }
 0x852   :  { %v1296_v16 = vpop.f32.mrb[12].mxu0 }
 0x853   :  { %v1297_v17 = vadd.f32 %v1296_v16, %v1221_v53  ;;  %v2392_v18 = vpop.f32.mrb[13].mxu0 }
 0x854   :  { %v2544_v18 = vmov 4  }
 0x855   :  { %v1300_v20 = vadd.f32 %v1297_v17, %v2734_v22 }
 0x857   :  { %2394 = vmatpush3.xpose.msk.msra.mxu1 %vm150_vm5, %v1300_v20 }
 0x85a   :  { %2396 = vmatmul.mubr.msk.f32.vlgmr.msra.gmra.mrb[16].mxu1 %vm150_vm5, %v1227_v47 }
 0x85b   :  { %1795 = vmatprep.mubr.f32.mxu1 %v2526_v0 }
 0x86b   :  { %v265_v26 = vpop.permute.xlu1 %264 }
 0x86c   :  { %v2854_v30 = vsub.f32 %v257_v24, %v265_v26 }
 0x86e   :  { %v672_v31 = vmul.f32 %v2854_v30, %v2854_v30 }
 0x86f   :  { %v982_v32 = vpop.permute.xlu1 %981  ;;  %v992_v22 = vpop.permute.xlu0 %991 }
 0x870   :  { %v984_v33 = vmul.f32 %v982_v32, %v2760_v35  ;;  %674 = vrot.lane.b32.xlu0 %v672_v31, %s2538_s29  ;;  %v691_v31 = vlaneseq }
 0x872   :  { %v2860_v11 = vsub.f32 %v984_v33, %v992_v22  ;;  %v2901_v33 = vand.u32 127, %v691_v31 }
 0x873   :  { %v243_v42 = vpop.permute.xlu1 %242  ;;  %v249_v44 = vpop.permute.xlu0 %248 }
 0x874   :  { %v1384_v38 = vmul.f32 %v2860_v11, %v2860_v11  ;;  %v245_v43 = vmul.f32 %v243_v42, %v2665_v25  ;;  %v1397_v21 = vsub.f32 0.0, %v2860_v11  ;;  %vm700_vm10 = vcmp.eq.s32.totalorder %v2901_v33, 1 }
 0x875   :  { %vm693_vm11 = vcmp.eq.s32.totalorder %v2901_v33, 0  ;;  %vm707_vm12 = vcmp.eq.s32.totalorder %v2901_v33, 2  ;;  %vm715_vm13 = vcmp.eq.s32.totalorder %v2901_v33, 3  ;;  %vm723_vm14 = vcmp.eq.s32.totalorder %v2901_v33, 4 }
 0x876   :  { %1386 = vrot.lane.b32.xlu0 %v1384_v38, %s2538_s29  ;;  %v251_v47 = vsub.f32 %v245_v43, %v249_v44 }
 0x877   :  { %v970_v46 = vpop.permute.xlu1 %969  ;;  %v976_v34 = vpop.permute.xlu0 %975 }
 0x878   :  { %v972_v48 = vmul.f32 %v970_v46, %v2760_v35  ;;  %v252_v50 = vmax.f32 %v251_v47, 0.0 }
 0x87a   :  { %v978_v52 = vsub.f32 %v972_v48, %v976_v34  ;;  %v2869_v53 = vadd.f32 0.0001, %v252_v50 }
 0x87b   :  { %v669_v54 = vpop.permute.xlu1 %668 }
 0x87c   :  { %v979_v55 = vmax.f32 %v978_v52, 0.0  ;;  %v671_v56 = vmul.f32 %v669_v54, %v2869_v53 }
 0x87e   :  { %v2872_v59 = vadd.f32 0.0001, %v979_v55 }
 0x87f   :  { %v1381_v62 = vpop.permute.xlu1 %1380 }
 0x880   :  { %v1383_v63 = vmul.f32 %v1381_v62, %v2872_v59 }
 0x8e2   :  { %v675_v58 = vpop.permute.xlu0 %674 }
 0x8e3   :  { %v677_v61 = vsub.f32 %v671_v56, %v675_v58 }
 0x8e5   :  { %v678_v25 = vadd.f32 1e-06, %v677_v61 }
 0x8e7   :  { %2498 = vrcp.f32 %v678_v25 }
 0x8e8   :  { %v1387_v1 = vpop.permute.xlu0 %1386 }
 0x8e9   :  { %v1389_v35 = vsub.f32 %v1383_v63, %v1387_v1 }
 0x8eb   :  { %v1390_v2 = vadd.f32 1e-06, %v1389_v35 }
 0x8ed   :  { %2500 = vrcp.f32 %v1390_v2 }
 0x8f1   :  { %v2499_v5 = vpop.eup %2498 }
 0x8f2   :  { %686 = vrot.lane.b32.xlu0 %v2499_v5, %s2535_s4  ;;  %681 = vrot.lane.b32.xlu1 %v2499_v5, %s2534_s0 }
 0x8f7   :  { %v2501_v6 = vpop.eup %2500 }
 0x8f8   :  { %1398 = vrot.lane.b32.xlu0 %v2501_v6, %s2535_s4  ;;  %1393 = vrot.lane.b32.xlu1 %v2501_v6, %s2534_s0  ;;  %v1402_v26 = vmul.f32 %v2501_v6, %v2872_v59 }
 0x8fc   :  { %702 = vperm.xlu0 %2446, %v2802_v49   ;;  %696 = vperm.xlu1 %2445, %v2820_v57   ;;  %v685_v57 = vsub.f32 0.0, %v2854_v30 }
 0x900   :  { %2449 = vset.pattern.permute.xlu0 %v2542_v41  ;;  %2447 = vset.pattern.permute.xlu1 %v2543_v7 }
 0x901   :  { %1405 = vperm.xlu0 %2449, %v2824_v60   ;;  %v690_v60 = vmul.f32 %v2499_v5, %v2869_v53 }
 0x905   :  { %2452 = vset.pattern.permute.xlu0 %v2543_v7 }
 0x92d   :  { %v1372_v8 = vpop.f32.mrb[16].mxu1 }
 0x92e   :  { %v1376_v9 = vmul.f32 0.015625, %v1372_v8  ;;  %v2397_v4 = vpop.f32.mrb[17].mxu1 }
 0x930   :  { %1378 = vst.msk [vmem:[#allocation3 + $0x4] sm:$0xf] %vm665_vm9, %v1376_v9 }
 0x964   :  { %v682_v10 = vpop.permute.xlu1 %681  ;;  %v687_v49 = vpop.permute.xlu0 %686 }
 0x965   :  { %v684_v13 = vmul.f32 %v682_v10, %v2843_v12  ;;  %v689_v14 = vmul.f32 %v687_v49, %v685_v57  ;;  %v1946_v57 = vld [vmem:[#allocation3 + $0x4] sm:$0xf] }
 0x967   :  { %710 = vperm.xlu1 %2447, %v684_v13  }
 0x96a   :  { %v1394_v16 = vpop.permute.xlu1 %1393  ;;  %v1399_v20 = vpop.permute.xlu0 %1398 }
 0x96b   :  { %v1396_v17 = vmul.f32 %v1394_v16, %v2846_v15  ;;  %2448 = vset.pattern.permute.xlu1 %v2544_v18  ;;  %v1401_v24 = vmul.f32 %v1399_v20, %v1397_v21  ;;  %v2947_v16 = vld [vmem:[%s3163_s5] sm:$0x7] }
 0x96c   :  { %718 = vperm.xlu1 %2448, %v689_v14   ;;  %v1592_v14 = vld [vmem:[#allocation3] sm:$0xf]  ;;  %v1498_v21 = vld [vmem:[%s3164_s2] sm:$0xf] }
 0x96d   :  { %1417 = vperm.xlu0 %2452, %v1396_v17   ;;  %v1503_v17 = vshrl.u32 %v691_v31, 7 }
 0x96f   :  { %v1508_v20 = vsub.s32 2, %v1503_v17 }
 0x970   :  { %2450 = vset.pattern.permute.xlu1 %v2541_v40 }
 0x971   :  { %1410 = vperm.xlu1 %2450, %v2807_v51   ;;  %2455 = vset.pattern.permute.xlu0 %v2530_v23 }
 0x975   :  { %2451 = vset.pattern.permute.xlu1 %v2528_v3 }
 0x976   :  { %726 = vperm.xlu1 %2451, %v690_v60   ;;  %v1504_v60 = vsub.s32 0, %v1503_v17 }
 0x97a   :  { %2453 = vset.pattern.permute.xlu1 %v2544_v18 }
 0x97b   :  { %1424 = vperm.xlu1 %2453, %v1401_v24   ;;  %v697_v51 = vpop.permute.xlu1 %696  ;;  %v703_v22 = vpop.permute.xlu0 %702  ;;  %v1529_v24 = vsub.s32 1, %v1503_v17 }
 0x97c   :  { %v705_v42 = vsel %vm700_vm10, %v703_v22, 0.0  ;;  %v699_v43 = vsel %vm693_vm11, %v697_v51, 0.0  ;;  %v1505_v51 = vrot.slane %v1498_v21, %v1504_v60 }
 0x97d   :  { %v2913_v47 = vadd.f32 %v705_v42, %v699_v43  ;;  %v1530_v22 = vrot.slane %v1498_v21, %v1529_v24 }
 0x97e   :  { %v1515_v42 = vrot.slane %v1505_v51, %v1504_v60 }
 0x97f   :  { %2454 = vset.pattern.permute.xlu1 %v2528_v3 }
 0x980   :  { %1431 = vperm.xlu1 %2454, %v1402_v26   ;;  %v1406_v34 = vpop.permute.xlu0 %1405  ;;  %v1533_v26 = vsub.s32 3, %v1503_v17 }
 0x981   :  { %v1408_v61 = vsel %vm693_vm11, %v1406_v34, 0.0 }
 0x984   :  { %2456 = vset.pattern.permute.xlu1 %v2542_v41 }
 0x9e6   :  { %v711_v32 = vpop.permute.xlu1 %710 }
 0x9e7   :  { %v713_v44 = vsel %vm707_vm12, %v711_v32, 0.0  ;;  %v1509_v32 = vrot.slane %v1498_v21, %v1508_v20 }
 0x9e8   :  { %v714_v50 = vadd.f32 %v713_v44, %v2913_v47 }
 0x9e9   :  { %v1519_v43 = vrot.slane %v1509_v32, %v1504_v60 }
 0x9eb   :  { %v719_v38 = vpop.permute.xlu1 %718 }
 0x9ec   :  { %v721_v48 = vsel %vm715_vm13, %v719_v38, 0.0  ;;  %v1418_v62 = vpop.permute.xlu0 %1417  ;;  %v1534_v38 = vrot.slane %v1498_v21, %v1533_v26 }
 0x9ed   :  { %v722_v52 = vadd.f32 %v721_v48, %v714_v50  ;;  %v1420_v1 = vsel %vm707_vm12, %v1418_v62, 0.0  ;;  %v1540_v48 = vrot.slane %v1530_v22, %v1529_v24 }
 0x9ee   :  { %v1544_v50 = vrot.slane %v1534_v38, %v1529_v24 }
 0x9f0   :  { %v1411_v46 = vpop.permute.xlu1 %1410 }
 0x9f1   :  { %v1413_v55 = vsel %vm700_vm10, %v1411_v46, 0.0 }
 0x9f2   :  { %v2925_v25 = vadd.f32 %v1413_v55, %v1408_v61 }
 0x9f4   :  { %v1421_v2 = vadd.f32 %v1420_v1, %v2925_v25 }
 0x9f5   :  { %v727_v54 = vpop.permute.xlu1 %726 }
 0x9f6   :  { %v729_v56 = vsel %vm723_vm14, %v727_v54, 0.0 }
 0x9f7   :  { %v730_v58 = vadd.f32 %v729_v56, %v722_v52 }
 0x9f9   :  { %731 = vst.msk [vmem:[#allocation2] sm:$0xf] %vm665_vm9, %v730_v58 }
 0x9fa   :  { %v1425_v63 = vpop.permute.xlu1 %1424 }
 0x9fb   :  { %v1427_v35 = vsel %vm715_vm13, %v1425_v63, 0.0 }
 0x9fc   :  { %v1428_v5 = vadd.f32 %v1427_v35, %v1421_v2 }
 0x9ff   :  { %v1432_v6 = vpop.permute.xlu1 %1431 }
 0xa00   :  { %v1434_v8 = vsel %vm723_vm14, %v1432_v6, 0.0  ;;  %v1500_v9 = vld [vmem:[#allocation2] sm:$0xf] }
 0xa01   :  { %v1435_v4 = vadd.f32 %v1434_v8, %v1428_v5  ;;  %1546 = vperm.xlu1 %2456, %v1500_v9   ;;  %1522 = vperm.xlu0 %2455, %v1500_v9   ;;  %v1559_v10 = vmul.f32 2.0, %v1500_v9 }
 0xa03   :  { %1437 = vst.msk [vmem:[#allocation2 + $0x4] sm:$0xf] %vm665_vm9, %v1435_v4 }
 0xa05   :  { %2457 = vset.pattern.permute.xlu1 %v2541_v40  ;;  %2458 = vset.pattern.permute.xlu0 %v2528_v3 }
 0xa06   :  { %1552 = vperm.xlu1 %2457, %v1500_v9   ;;  %1562 = vperm.xlu0 %2458, %v1559_v10  }
 0xa0a   :  { %2459 = vset.pattern.permute.xlu1 %v2544_v18  ;;  %2461 = vset.pattern.permute.xlu0 %v2542_v41  ;;  %v1889_v13 = vld [vmem:[#allocation2 + $0x4] sm:$0xf] }
 0xa0b   :  { %1572 = vperm.xlu1 %2459, %v1500_v9   ;;  %1898 = vperm.xlu0 %2461, %v1889_v13   ;;  %v1911_v49 = vmul.f32 2.0, %v1889_v13 }
 0xa0f   :  { %2460 = vset.pattern.permute.xlu1 %v2530_v23  ;;  %2464 = vset.pattern.permute.xlu0 %v2544_v18 }
 0xa10   :  { %1924 = vperm.xlu0 %2464, %v1889_v13   ;;  %1892 = vperm.xlu1 %2460, %v1889_v13  }
 0xa14   :  { %2462 = vset.pattern.permute.xlu1 %v2541_v40 }
 0xa15   :  { %1904 = vperm.xlu1 %2462, %v1889_v13  }
 0xa19   :  { %2463 = vset.pattern.permute.xlu1 %v2528_v3 }
 0xa1a   :  { %1914 = vperm.xlu1 %2463, %v1911_v49  }
 0xa2e   :  { %1947 = vxpose.xlu0.b32.start.end [1/1] (short) (narrow) %v1946_v57, 8 }
 0xa43   :  { %1593 = vxpose.xlu1.b32.start.end [1/1] (short) (narrow) %v1592_v14, 8 }
 0xa57   :  { %1726 = vrot.lane.b32.xlu0 %v2947_v16, %s2531_s20 }
 0xa58   :  { %2466 = vset.pattern.permute.xlu0 %v2528_v3 }
 0xa5b   :  { %1095 = vrot.lane.b32.xlu0 %v2770_v39, %s2535_s4 }
 0xa61   :  { %373 = vrot.lane.b32.xlu1 %v2672_v29, %s2534_s0 }
 0xa62   :  { %2465 = vset.pattern.permute.xlu1 %v2530_v23 }
 0xa65   :  { %1099 = vrot.lane.b32.xlu1 %v2770_v39, %s2534_s0 }
 0xa69   :  { %369 = vrot.lane.b32.xlu1 %v2672_v29, %s2535_s4 }
 0xa80   :  { %v1523_v44 = vpop.permute.xlu0 %1522  ;;  %v1547_v46 = vpop.permute.xlu1 %1546 }
 0xa81   :  { %v1525_v34 = vsub.f32 %v1515_v42, %v1523_v44  ;;  %v1526_v31 = vsub.f32 %v1519_v43, %v1523_v44  ;;  %v1549_v62 = vsub.f32 %v1540_v48, %v1547_v46  ;;  %v1550_v63 = vsub.f32 %v1544_v50, %v1547_v46 }
 0xa85   :  { %v1563_v52 = vpop.permute.xlu0 %1562  ;;  %v1553_v54 = vpop.permute.xlu1 %1552 }
 0xa86   :  { %v1565_v55 = vmul.f32 %v1563_v52, %v1525_v34  ;;  %v1566_v56 = vmul.f32 %v1563_v52, %v1526_v31  ;;  %v1555_v58 = vmul.f32 %v1553_v54, %v1525_v34  ;;  %v1556_v61 = vmul.f32 %v1553_v54, %v1526_v31 }
 0xa88   :  { %v1567_v1 = vmul.f32 %v1565_v55, %v1549_v62  ;;  %v1568_v35 = vmul.f32 %v1566_v56, %v1550_v63  ;;  %v1557_v2 = vmul.f32 %v1555_v58, %v1525_v34  ;;  %v1558_v5 = vmul.f32 %v1556_v61, %v1526_v31 }
 0xa8a   :  { %v1573_v6 = vpop.permute.xlu1 %1572  ;;  %v1569_v4 = vadd.f32 %v1567_v1, %v1557_v2  ;;  %v1570_v10 = vadd.f32 %v1568_v35, %v1558_v5  ;;  %v1899_v60 = vpop.permute.xlu0 %1898 }
 0xa8b   :  { %v1575_v8 = vmul.f32 %v1573_v6, %v1549_v62  ;;  %v1576_v9 = vmul.f32 %v1573_v6, %v1550_v63  ;;  %v1901_v44 = vsub.f32 %v1540_v48, %v1899_v60  ;;  %v1902_v46 = vsub.f32 %v1544_v50, %v1899_v60 }
 0xa8d   :  { %v1577_v13 = vmul.f32 %v1575_v8, %v1549_v62  ;;  %v1578_v49 = vmul.f32 %v1576_v9, %v1550_v63 }
 0xa8f   :  { %v1579_v57 = vadd.f32 %v1577_v13, %v1569_v4  ;;  %v1580_v14 = vadd.f32 %v1578_v49, %v1570_v10  ;;  %v1893_v17 = vpop.permute.xlu1 %1892  ;;  %v1925_v38 = vpop.permute.xlu0 %1924 }
 0xa90   :  { %v1895_v32 = vsub.f32 %v1515_v42, %v1893_v17  ;;  %v1896_v22 = vsub.f32 %v1519_v43, %v1893_v17  ;;  %v1927_v54 = vmul.f32 %v1925_v38, %v1901_v44  ;;  %v1928_v55 = vmul.f32 %v1925_v38, %v1902_v46 }
 0xa91   :  { %v1581_v20 = vmul.f32 -0.5, %v1579_v57  ;;  %v1582_v21 = vmul.f32 -0.5, %v1580_v14 }
 0xa92   :  { %v1929_v35 = vmul.f32 %v1927_v54, %v1901_v44  ;;  %v1930_v2 = vmul.f32 %v1928_v55, %v1902_v46 }
 0xa93   :  { %v1583_v24 = vmul.f32 1.442695, %v1581_v20  ;;  %v1585_v26 = vmul.f32 1.442695, %v1582_v21 }
 0xa94   :  { %v1905_v51 = vpop.permute.xlu1 %1904 }
 0xa95   :  { %2502 = vpow2.f32 %v1583_v24  ;;  %v1907_v34 = vmul.f32 %v1905_v51, %v1895_v32  ;;  %v1908_v31 = vmul.f32 %v1905_v51, %v1896_v22 }
 0xa96   :  { %2504 = vpow2.f32 %v1585_v26 }
 0xa97   :  { %v1909_v61 = vmul.f32 %v1907_v34, %v1895_v32  ;;  %v1910_v62 = vmul.f32 %v1908_v31, %v1896_v22 }
 0xa99   :  { %v1915_v52 = vpop.permute.xlu1 %1914 }
 0xa9a   :  { %v1917_v56 = vmul.f32 %v1915_v52, %v1895_v32  ;;  %v1918_v58 = vmul.f32 %v1915_v52, %v1896_v22 }
 0xa9c   :  { %v1919_v63 = vmul.f32 %v1917_v56, %v1901_v44  ;;  %v1920_v1 = vmul.f32 %v1918_v58, %v1902_v46 }
 0xa9e   :  { %v1921_v5 = vadd.f32 %v1919_v63, %v1909_v61  ;;  %v1922_v6 = vadd.f32 %v1920_v1, %v1910_v62 }
 0xa9f   :  { %v2965_v42 = vpop.eup %2502 }
 0xaa0   :  { %v2967_v43 = vpop.eup %2504  ;;  %v1931_v48 = vadd.f32 %v1929_v35, %v1921_v5  ;;  %v1932_v50 = vadd.f32 %v1930_v2, %v1922_v6  ;;  %v1705_v1 = vsel %vm421_vm6, %v2965_v42, 0.0 }
 0xaa1   :  { %v1589_v8 = vcombine.low %v2965_v42, %v2967_v43  ;;  %2276 = vmatprep.subr.msk.mxu0 %vm421_vm6, %v2967_v43  ;;  %v1712_v63 = vsel %vm421_vm6, %v2967_v43, 0.0  ;;  %v1706_v2 = vrot.slane %v1705_v1, 4 }
 0xaa2   :  { %v1933_v9 = vmul.f32 -0.5, %v1931_v48  ;;  %v1934_v4 = vmul.f32 -0.5, %v1932_v50  ;;  %2277 = vmatpush1.msk.msra.mxu0 %vm421_vm6, %v2965_v42  ;;  %v1713_v35 = vrot.slane %v1712_v63, 4 }
 0xaa3   :  { %1591 = vst [vmem:[%s3165_s8] sm:$0xff] %v1589_v8  ;;  %v1707_v50 = vadd.f32 %v1706_v2, %v1705_v1 }
 0xaa4   :  { %v1935_v10 = vmul.f32 1.442695, %v1933_v9  ;;  %v1937_v13 = vmul.f32 1.442695, %v1934_v4  ;;  %v1714_v6 = vadd.f32 %v1713_v35, %v1712_v63 }
 0xaa6   :  { %2506 = vpow2.f32 %v1935_v10  ;;  %v1715_v9 = vrot.slane %v1714_v6, 2  ;;  %v1708_v10 = vrot.slane %v1707_v50, 2 }
 0xaa7   :  { %2508 = vpow2.f32 %v1937_v13 }
 0xaae   :  { %v1963_v60 = vpop.trf.xlu0 }
 0xab0   :  { %v2978_v49 = vpop.eup %2506 }
 0xab1   :  { %v2980_v57 = vpop.eup %2508  ;;  %v2057_v5 = vsel %vm421_vm6, %v2978_v49, 0.0 }
 0xab2   :  { %v1941_v14 = vcombine.low %v2978_v49, %v2980_v57  ;;  %2284 = vmatprep.subr.msk.mxu0 %vm421_vm6, %v2980_v57  ;;  %v2058_v8 = vrot.slane %v2057_v5, 4 }
 0xab4   :  { %2283 = vst [vmem:[%s3165_s8 + $0x8] sm:$0xff] %v1941_v14  ;;  %v2059_v13 = vadd.f32 %v2058_v8, %v2057_v5  ;;  %v1716_v14 = vadd.f32 %v1715_v9, %v1714_v6 }
 0xac3   :  { %v1609_v17 = vpop.trf.xlu1 }
 0xac4   :  { %2278 = vmatmul.mubr.msk.f32.vlgmr.msra.gmra.mrb[14].mxu0 %vm509_vm7, %v1609_v17 }
 0xac5   :  { %2285 = vmatpush1.msk.msra.mxu0 %vm421_vm6, %v2978_v49  ;;  %2050 = vmatprep.mubr.f32.mxu0 %v2526_v0 }
 0xac8   :  { %2286 = vmatmul.mubr.msk.f32.vlgmr.msra.gmra.mrb[16].mxu0 %vm509_vm7, %v1963_v60  ;;  %v1709_v60 = vadd.f32 %v1708_v10, %v1707_v50 }
 0xac9   :  { %2141 = vmatprep.mubr.f32.mxu0 %v2526_v0 }
 0xad3   :  { %v374_v20 = vpop.permute.xlu1 %373 }
 0xad4   :  { %v2996_v21 = vmul.f32 %v374_v20, %v2669_v27  ;;  %v2060_v20 = vrot.slane %v2059_v13, 2 }
 0xad6   :  { %394 = vrot.lane.b32.xlu1 %v2996_v21, %s2538_s29 }
 0xad7   :  { %v1100_v24 = vpop.permute.xlu1 %1099 }
 0xad8   :  { %v3001_v26 = vmul.f32 %v1100_v24, %v2767_v37  ;;  %v1717_v24 = vrot.slane %v1716_v14, 1 }
 0xada   :  { %230 = vperm.xlu1 %2465, %v2776_v45   ;;  %1120 = vrot.lane.b32.xlu0 %v3001_v26, %s2538_s29  ;;  %v1133_v45 = vmul.f32 %v3001_v26, %v3001_v26 }
 0xadb   :  { %v370_v51 = vpop.permute.xlu1 %369 }
 0xadc   :  { %v372_v32 = vmul.f32 %v370_v51, %v2669_v27 }
 0xade   :  { %377 = vrot.lane.b32.xlu0 %v2672_v29, %s2539_s30  ;;  %v381_v22 = vmul.f32 %v372_v32, %v372_v32  ;;  %2467 = vset.pattern.permute.xlu1 %v2544_v18 }
 0xae0   :  { %383 = vrot.lane.b32.xlu1 %v381_v22, %s2534_s0  ;;  %v2061_v22 = vadd.f32 %v2060_v20, %v2059_v13 }
 0xae2   :  { %389 = vrot.lane.b32.xlu0 %v2672_v29, %s2537_s26 }
 0xae6   :  { %403 = vrot.lane.b32.xlu0 %v2672_v29, %s2536_s25  ;;  %v3024_v29 = vpop.permute.xlu0 %1726 }
 0xaea   :  { %737 = vperm.xlu0 %2466, %v2869_v53   ;;  %v407_v53 = vmul.f32 %v2996_v21, %v2996_v21  ;;  %v1096_v46 = vpop.permute.xlu0 %1095 }
 0xaeb   :  { %v3033_v52 = vmul.f32 %v1096_v46, %v2767_v37 }
 0xaee   :  { %2469 = vset.pattern.permute.xlu0 %v2542_v41 }
 0xaef   :  { %758 = vperm.xlu0 %2469, %v372_v32  }
 0xaf3   :  { %1129 = vrot.lane.b32.xlu0 %v2770_v39, %s2536_s25 }
 0xaf4   :  { %2472 = vset.pattern.permute.xlu0 %v2543_v7 }
 0xaf7   :  { %1135 = vrot.lane.b32.xlu0 %v1133_v45, %s2539_s30  ;;  %v1718_v45 = vadd.f32 %v1717_v24, %v1716_v14 }
 0xaf9   :  { %v1720_v46 = vadd.f32 1.0, %v1718_v45 }
 0xafb   :  { %2510 = vrcp.f32 %v1720_v46 }
 0xb48   :  { %v395_v38 = vpop.permute.xlu1 %394 }
 0xb49   :  { %v397_v44 = vmul.f32 %v395_v38, %v372_v32  ;;  %v1710_v32 = vrot.slane %v1709_v60, 1 }
 0xb4b   :  { %399 = vrot.lane.b32.xlu1 %v397_v44, %s2539_s30  ;;  %v1711_v44 = vadd.f32 %v1710_v32, %v1709_v60 }
 0xb4c   :  { %v1121_v34 = vpop.permute.xlu0 %1120 }
 0xb4d   :  { %v1123_v58 = vmul.f32 %v1121_v34, %v3033_v52 }
 0xb4f   :  { %409 = vrot.lane.b32.xlu1 %v407_v53, %s2539_s30  ;;  %v2062_v53 = vrot.slane %v2061_v22, 1 }
 0xb53   :  { %744 = vperm.xlu1 %2467, %v2854_v30   ;;  %v378_v30 = vpop.permute.xlu0 %377 }
 0xb54   :  { %v380_v56 = vmul.f32 %v378_v30, %v2669_v27 }
 0xb57   :  { %2468 = vset.pattern.permute.xlu1 %v2543_v7 }
 0xb58   :  { %750 = vperm.xlu1 %2468, %v2843_v12   ;;  %v1107_v12 = vmul.f32 %v3033_v52, %v3033_v52 }
 0xb59   :  { %v231_v31 = vpop.permute.xlu1 %230 }
 0xb5a   :  { %v233_v54 = vmul.f32 %v2648_v19, %v231_v31  ;;  %v1719_v31 = vadd.f32 1.0, %v1711_v44 }
 0xb5c   :  { %732 = vst.msk [vmem:[%s3162_s7] sm:$0xf] %vm143_vm4, %v233_v54  ;;  %1103 = vrot.lane.b32.xlu1 %v2770_v39, %s2539_s30  ;;  %v2063_v54 = vadd.f32 %v2062_v53, %v2061_v22  ;;  %2512 = vrcp.f32 %v1719_v31  ;;  %v2545_v22 = vmov 12  }
 0xb5d   :  { %2470 = vset.pattern.permute.xlu1 %v2528_v3  ;;  %v384_v55 = vpop.permute.xlu1 %383 }
 0xb5e   :  { %v386_v19 = vsub.f32 %v380_v56, %v384_v55  ;;  %v2511_v56 = vpop.eup %2510 }
 0xb60   :  { %1109 = vrot.lane.b32.xlu1 %v1107_v12, %s2534_s0  ;;  %v387_v61 = vmax.f32 %v386_v19, 0.0  ;;  %v2071_v12 = vadd.f32 1.0, %v2063_v54 }
 0xb62   :  { %v388_v62 = vadd.f32 0.0001, %v387_v61 }
 0xb64   :  { %1115 = vrot.lane.b32.xlu1 %v2770_v39, %s2537_s26  ;;  %v2064_v39 = vsel %vm421_vm6, %v2980_v57, 0.0 }
 0xb65   :  { %v2065_v48 = vrot.slane %v2064_v39, 4 }
 0xb67   :  { %v2066_v4 = vadd.f32 %v2065_v48, %v2064_v39 }
 0xb68   :  { %1125 = vrot.lane.b32.xlu1 %v1123_v58, %s2539_s30  ;;  %v2513_v58 = vpop.eup %2512 }
 0xb69   :  { %v2067_v17 = vrot.slane %v2066_v4, 2 }
 0xb6b   :  { %v2068_v51 = vadd.f32 %v2067_v17, %v2066_v4 }
 0xb6c   :  { %770 = vperm.xlu1 %2470, %v388_v62  }
 0xb6d   :  { %v2069_v38 = vrot.slane %v2068_v51, 1 }
 0xb6f   :  { %v2070_v34 = vadd.f32 %v2069_v38, %v2068_v51 }
 0xb70   :  { %2471 = vset.pattern.permute.xlu1 %v2544_v18 }
 0xb71   :  { %v2072_v30 = vadd.f32 1.0, %v2070_v34 }
 0xb73   :  { %2514 = vrcp.f32 %v2072_v30 }
 0xb74   :  { %2516 = vrcp.f32 %v2071_v12 }
 0xb7d   :  { %v2515_v1 = vpop.eup %2514 }
 0xb7e   :  { %v2517_v2 = vpop.eup %2516 }
 0xb97   :  { %v1700_v55 = vpop.f32.mrb[14].mxu0 }
 0xb98   :  { %v1702_v19 = vpop.f32.mrb[15].mxu0  ;;  %v1723_v62 = vmul.f32 %v2513_v58, %v1700_v55 }
 0xb99   :  { %v1724_v61 = vmul.f32 %v2511_v56, %v1702_v19 }
 0xb9b   :  { %1731 = vmatprep.subr.mxu1 %v1724_v61  ;;  %v2052_v63 = vpop.f32.mrb[16].mxu0 }
 0xb9c   :  { %1732 = vmatpush1.msra.mxu1 %v1723_v62  ;;  %v2054_v35 = vpop.f32.mrb[17].mxu0  ;;  %v2075_v5 = vmul.f32 %v2517_v2, %v2052_v63 }
 0xb9d   :  { %v2076_v39 = vmul.f32 %v2515_v1, %v2054_v35  ;;  %2279 = vmatmul.mubr.msk.f32.vlgmr.msra.gmra.mrb[18].mxu1 %vm1728_vm15, %v3024_v29  ;;  %2280 = vmatprep.subr.msk.mxu1 %vm421_vm6, %v2967_v43 }
 0xb9e   :  { %2281 = vmatpush1.msk.msra.mxu1 %vm421_vm6, %v2965_v42  ;;  %1868 = vmatprep.mubr.f32.mxu1 %v2526_v0  ;;  %v390_v42 = vpop.permute.xlu0 %389 }
 0xb9f   :  { %2077 = vmatprep.subr.mxu0 %v2076_v39  ;;  %v392_v43 = vmul.f32 %v390_v42, %v2669_v27 }
 0xba0   :  { %2078 = vmatpush1.msra.mxu0 %v2075_v5 }
 0xba1   :  { %2287 = vmatmul.mubr.msk.f32.vlgmr.msra.gmra.mrb[18].mxu0 %vm1728_vm15, %v3024_v29  ;;  %2288 = vmatprep.subr.msk.mxu0 %vm421_vm6, %v2980_v57 }
 0xba2   :  { %2289 = vmatpush1.msk.msra.mxu0 %vm421_vm6, %v2978_v49  ;;  %2212 = vmatprep.mubr.f32.mxu0 %v2526_v0  ;;  %v404_v6 = vpop.permute.xlu0 %403 }
 0xba3   :  { %v406_v50 = vmul.f32 %v404_v6, %v2669_v27 }
 0xba5   :  { %2282 = vmatmul.mubr.msk.f32.vlgmr.msra.gmra.mrb[18].mxu1 %vm509_vm7, %v2947_v16 }
 0xba6   :  { %v738_v27 = vpop.permute.xlu0 %737 }
 0xba9   :  { %2290 = vmatmul.mubr.msk.f32.vlgmr.msra.gmra.mrb[18].mxu0 %vm509_vm7, %v2947_v16 }
 0xbbd   :  { %v400_v48 = vpop.permute.xlu1 %399 }
 0xbbe   :  { %v402_v29 = vsub.f32 %v392_v43, %v400_v48 }
 0xbc0   :  { %777 = vperm.xlu1 %2471, %v402_v29  }
 0xbc1   :  { %v410_v57 = vpop.permute.xlu1 %409 }
 0xbc2   :  { %v412_v8 = vsub.f32 %v406_v50, %v410_v57 }
 0xbc4   :  { %v413_v49 = vmax.f32 %v412_v8, 0.0  ;;  %2474 = vset.pattern.permute.xlu1 %v2530_v23  ;;  %v740_v23 = vsel %vm707_vm12, %v738_v27, 0.0 }
 0xbc5   :  { %957 = vperm.xlu1 %2474, %v2763_v36  }
 0xbc6   :  { %v414_v0 = vadd.f32 0.0001, %v413_v49 }
 0xbc8   :  { %784 = vperm.xlu0 %2472, %v414_v0  }
 0xbc9   :  { %2475 = vset.pattern.permute.xlu1 %v2528_v3 }
 0xbca   :  { %1444 = vperm.xlu1 %2475, %v2872_v59  }
 0xbcc   :  { %2473 = vset.pattern.permute.xlu0 %v2541_v40  ;;  %v741_v40 = vadd.f32 %v740_v23, %v2913_v47 }
 0xbcd   :  { %763 = vperm.xlu0 %2473, %v2996_v21  }
 0xbce   :  { %2476 = vset.pattern.permute.xlu1 %v2543_v7 }
 0xbcf   :  { %1457 = vperm.xlu1 %2476, %v2846_v15   ;;  %v759_v15 = vpop.permute.xlu0 %758 }
 0xbd0   :  { %v761_v31 = vsel %vm693_vm11, %v759_v15, 0.0 }
 0xbd1   :  { %1471 = vperm.xlu0 %2473, %v3001_v26  }
 0xbd2   :  { %v745_v36 = vpop.permute.xlu1 %744 }
 0xbd3   :  { %2477 = vset.pattern.permute.xlu1 %v2542_v41  ;;  %v747_v59 = vsel %vm715_vm13, %v745_v36, 0.0  ;;  %v1130_v47 = vpop.permute.xlu0 %1129 }
 0xbd4   :  { %1466 = vperm.xlu1 %2477, %v3033_v52   ;;  %v748_v21 = vadd.f32 %v747_v59, %v741_v40  ;;  %v1132_v17 = vmul.f32 %v1130_v47, %v2767_v37 }
 0xbd5   :  { %2478 = vset.pattern.permute.xlu0 %v2544_v18 }
 0xbd6   :  { %1451 = vperm.xlu0 %2478, %v2860_v11  }
 0xbd7   :  { %v751_v26 = vpop.permute.xlu1 %750  ;;  %v1136_v13 = vpop.permute.xlu0 %1135 }
 0xbd8   :  { %v753_v9 = vsel %vm723_vm14, %v751_v26, 0.0  ;;  %2479 = vset.pattern.permute.xlu1 %v2528_v3  ;;  %v1138_v20 = vsub.f32 %v1132_v17, %v1136_v13 }
 0xbd9   :  { %v754_v41 = vadd.f32 %v753_v9, %v748_v21 }
 0xbda   :  { %v1139_v32 = vmax.f32 %v1138_v20, 0.0 }
 0xbdb   :  { %755 = vst.msk [vmem:[%s3166_s9] sm:$0xf] %vm665_vm9, %v754_v41  ;;  %v1104_v52 = vpop.permute.xlu1 %1103 }
 0xbdc   :  { %v1106_v18 = vmul.f32 %v1104_v52, %v2767_v37  ;;  %v1140_v45 = vadd.f32 0.0001, %v1139_v32 }
 0xbdf   :  { %v1110_v4 = vpop.permute.xlu1 %1109 }
 0xbe0   :  { %v1112_v11 = vsub.f32 %v1106_v18, %v1110_v4 }
 0xbe2   :  { %v1113_v10 = vmax.f32 %v1112_v11, 0.0 }
 0xbe3   :  { %v1116_v14 = vpop.permute.xlu1 %1115 }
 0xbe4   :  { %v1114_v60 = vadd.f32 0.0001, %v1113_v10  ;;  %v1118_v3 = vmul.f32 %v1116_v14, %v2767_v37 }
 0xbe6   :  { %1478 = vperm.xlu1 %2479, %v1114_v60  }
 0xbe7   :  { %v1126_v24 = vpop.permute.xlu1 %1125 }
 0xbe8   :  { %v1128_v51 = vsub.f32 %v1118_v3, %v1126_v24 }
 0xbea   :  { %2480 = vset.pattern.permute.xlu1 %v2545_v22  ;;  %1485 = vperm.xlu0 %2478, %v1128_v51  }
 0xbeb   :  { %1876 = vperm.xlu1 %2480, %v2947_v16   ;;  %v771_v38 = vpop.permute.xlu1 %770 }
 0xbec   :  { %v773_v54 = vsel %vm707_vm12, %v771_v38, 0.0 }
 0xbef   :  { %2481 = vset.pattern.permute.xlu1 %v2543_v7 }
 0xbf0   :  { %1492 = vperm.xlu1 %2481, %v1140_v45  }
 0xc3f   :  { %v778_v44 = vpop.permute.xlu1 %777 }
 0xc40   :  { %v780_v55 = vsel %vm715_vm13, %v778_v44, 0.0 }
 0xc44   :  { %v958_v53 = vpop.permute.xlu1 %957 }
 0xc45   :  { %v960_v46 = vmul.f32 %v2746_v28, %v958_v53 }
 0xc47   :  { %2272 = vst.msk [vmem:[%s3162_s7 + $0x8] sm:$0xf] %vm143_vm4, %v960_v46  ;;  %v785_v37 = vpop.permute.xlu0 %784 }
 0xc48   :  { %v787_v58 = vsel %vm723_vm14, %v785_v37, 0.0 }
 0xc49   :  { %v1445_v30 = vpop.permute.xlu1 %1444 }
 0xc4a   :  { %v1447_v56 = vsel %vm707_vm12, %v1445_v30, 0.0 }
 0xc4b   :  { %v1448_v62 = vadd.f32 %v1447_v56, %v2925_v25 }
 0xc4c   :  { %v764_v34 = vpop.permute.xlu0 %763 }
 0xc4d   :  { %v766_v16 = vsel %vm700_vm10, %v764_v34, 0.0 }
 0xc4e   :  { %v767_v7 = vadd.f32 %v766_v16, %v761_v31  ;;  %v1458_v63 = vpop.permute.xlu1 %1457 }
 0xc4f   :  { %v1460_v39 = vsel %vm723_vm14, %v1458_v63, 0.0 }
 0xc50   :  { %v774_v12 = vadd.f32 %v773_v54, %v767_v7  ;;  %v1472_v28 = vpop.permute.xlu0 %1471 }
 0xc51   :  { %v1474_v48 = vsel %vm700_vm10, %v1472_v28, 0.0 }
 0xc52   :  { %v781_v19 = vadd.f32 %v780_v55, %v774_v12 }
 0xc53   :  { %v1467_v25 = vpop.permute.xlu1 %1466 }
 0xc54   :  { %v788_v61 = vadd.f32 %v787_v58, %v781_v19  ;;  %v1469_v43 = vsel %vm693_vm11, %v1467_v25, 0.0 }
 0xc55   :  { %v1452_v1 = vpop.permute.xlu0 %1451  ;;  %v1475_v57 = vadd.f32 %v1474_v48, %v1469_v43 }
 0xc56   :  { %789 = vst.msk [vmem:[%s3166_s9 + $0x4] sm:$0xf] %vm665_vm9, %v788_v61  ;;  %v1454_v35 = vsel %vm715_vm13, %v1452_v1, 0.0 }
 0xc57   :  { %v1455_v2 = vadd.f32 %v1454_v35, %v1448_v62 }
 0xc59   :  { %v1461_v5 = vadd.f32 %v1460_v39, %v1455_v2 }
 0xc5b   :  { %2274 = vst.msk [vmem:[%s3166_s9 + $0x8] sm:$0xf] %vm665_vm9, %v1461_v5 }
 0xc65   :  { %v1479_v42 = vpop.permute.xlu1 %1478 }
 0xc66   :  { %v1481_v29 = vsel %vm707_vm12, %v1479_v42, 0.0 }
 0xc67   :  { %v1482_v49 = vadd.f32 %v1481_v29, %v1475_v57 }
 0xc69   :  { %v1486_v6 = vpop.permute.xlu0 %1485 }
 0xc6a   :  { %v1877_v50 = vpop.permute.xlu1 %1876  ;;  %v1488_v8 = vsel %vm715_vm13, %v1486_v6, 0.0 }
 0xc6b   :  { %v1489_v0 = vadd.f32 %v1488_v8, %v1482_v49 }
 0xc6f   :  { %v1493_v27 = vpop.permute.xlu1 %1492 }
 0xc70   :  { %v1495_v23 = vsel %vm723_vm14, %v1493_v27, 0.0 }
 0xc71   :  { %v1496_v36 = vadd.f32 %v1495_v23, %v1489_v0 }
 0xc73   :  { %2275 = vst.msk [vmem:[%s3166_s9 + $0xc] sm:$0xf] %vm665_vm9, %v1496_v36 }
 0xc78   :  { %v1870_v59 = vpop.f32.mrb[18].mxu1 }
 0xc79   :  { %v1879_v40 = vadd.f32 %v1877_v50, %v1870_v59  ;;  %v1872_v15 = vpop.f32.mrb[19].mxu1 }
 0xc7a   :  { %v1880_v21 = vadd.f32 %v1877_v50, %v1872_v15 }
 0xc7b   :  { %2518 = vtanh.f32 %v1879_v40 }
 0xc7c   :  { %2520 = vtanh.f32 %v1880_v21  ;;  %v2214_v26 = vpop.f32.mrb[18].mxu0 }
 0xc7d   :  { %v2219_v9 = vadd.f32 %v2214_v26, %v1877_v50  ;;  %v2216_v41 = vpop.f32.mrb[19].mxu0 }
 0xc7e   :  { %v2220_v52 = vadd.f32 %v2216_v41, %v1877_v50 }
 0xc7f   :  { %2522 = vtanh.f32 %v2219_v9 }
 0xc80   :  { %2524 = vtanh.f32 %v2220_v52 }
 0xc85   :  { %v2519_v33 = vpop.eup %2518 }
 0xc86   :  { %v2521_v47 = vpop.eup %2520 }
 0xc87   :  { %v1885_v18 = vcombine.low %v2519_v33, %v2521_v47 }
 0xc89   :  { %v2523_v4 = vpop.eup %2522  ;;  %1887 = vst [vmem:[%s3167_s6] sm:$0x77] %v1885_v18 }
 0xc8a   :  { %v2525_v11 = vpop.eup %2524 }
 0xc8b   :  { %v2225_v10 = vcombine.low %v2523_v4, %v2525_v11 }
 0xc8d   :  { %2291 = vst [vmem:[%s3167_s6 + $0x8] sm:$0x77] %v2225_v10 }

</bundles_post_ra>
